<compile_context>
chip_gen: v7x
topology: tpu7x:2x2x1
jax: 0.10.0
libtpu: 0.0.40
codegen_flags: <defaults>
</compile_context>

<pallas_src>
import functools

import jax
import jax.numpy as jnp
from jax.experimental import pallas as pl
from jax.experimental.pallas import tpu as pltpu


# Static architecture config (kept OUT of the jitted params pytree).
#   (cin, cout, (kh, kw), (pool_h, pool_w), transposed_output)
_GROUP_CFGS = (
    (1,   16,  (5, 3), (2, 1), True),
    (16,  32,  (5, 3), (2, 2), True),
    (32,  64,  (5, 3), (2, 1), True),
    (64,  128, (3, 3), (2, 2), False),
    (128, 128, (3, 3), (1, 1), False),
)


# ----------------------------------------------------------------------------
# Pallas kernel: fused conv-matmul + folded BN + ReLU + MaxPool (per stream)
# ----------------------------------------------------------------------------
def _conv_bn_relu_pool_kernel(x_ref, w_ref, b_ref, o_ref, *,
                              n_windows, transposed):
    """One conv group for one stream (azi or ele).

    transposed=True : x_ref (1, P, K, Mq), w_ref (1, Cout, K), b (1, Cout, 1)
                      -> o_ref (1, Cout, Mq)      (lane-dense Mq output)
    transposed=False: x_ref (1, P, Mq, K), w_ref (1, K, Cout), b (1, 1, Cout)
                      -> o_ref (1, Mq, Cout)

    BN scale is pre-folded into w; shift (b) + ReLU are applied once after the
    max over pooling windows (valid: max commutes with relu(x + const)).
    """
    w = w_ref[0]

    def mm(p):
        xw = x_ref[0, p]
        if transposed:
            return jnp.dot(w, xw, preferred_element_type=jnp.float32)
        return jnp.dot(xw, w, preferred_element_type=jnp.float32)

    accs = [mm(p) for p in range(n_windows)]
    # Balanced-tree MaxPool over the ph*pw windows (f32 accumulators).
    while len(accs) > 1:
        nxt = [jnp.maximum(accs[i], accs[i + 1])
               for i in range(0, len(accs) - 1, 2)]
        if len(accs) % 2:
            nxt.append(accs[-1])
        accs = nxt

    # Folded-BN shift + ReLU, applied ONCE after pooling.
    o_ref[0] = jnp.maximum(accs[0] + b_ref[0], 0.0).astype(o_ref.dtype)


def _conv_group_call(patches, wmat, shift, *, transposed):
    """patches: (2, P, A, B) bf16; wmat: (2, wa, wb) bf16; shift: f32."""
    S, P, A, B = patches.shape
    _, wa, wb = wmat.shape
    out_rows, out_cols = (wa, B) if transposed else (A, wb)
    kern = functools.partial(_conv_bn_relu_pool_kernel,
                             n_windows=P, transposed=transposed)
    return pl.pallas_call(
        kern,
        out_shape=jax.ShapeDtypeStruct((S, out_rows, out_cols), jnp.float32),
        grid=(S,),
        in_specs=[
            pl.BlockSpec((1, P, A, B), lambda s: (s, 0, 0, 0)),
            pl.BlockSpec((1, wa, wb), lambda s: (s, 0, 0)),
            pl.BlockSpec((1,) + shift.shape[1:], lambda s: (s, 0, 0)),
        ],
        out_specs=pl.BlockSpec((1, out_rows, out_cols), lambda s: (s, 0, 0)),
        compiler_params=pltpu.CompilerParams(
            dimension_semantics=("parallel",)),   # azi/ele -> 2 TCs on v7x
    )(patches, wmat, shift)


# ----------------------------------------------------------------------------
# Glue: im2col with pooling windows exposed, then one fused kernel per group
# ----------------------------------------------------------------------------
def _conv_group(x, group_params, cfg):
    """x: (2, N, H, W, Cin) f32 NHWC per stream -> (2, N, Hq, Wq, Cout) f32."""
    cin, cout, (kh, kw), (ph, pw), transposed = cfg
    S, N, H, W, Cin = x.shape
    assert Cin == cin
    xp = jnp.pad(x, ((0, 0), (0, 0), (1, 1), (1, 1), (0, 0)))
    Hp, Wp = H + 2, W + 2
    Ho, Wo = Hp - kh + 1, Wp - kw + 1
    Hq, Wq = Ho // ph, Wo // pw
    Mq = N * Hq * Wq
    K = kh * kw * cin

    if transposed:
        # channels-first so the contraction (ki,kj,cin) axis stacks on axis 1
        xcf = jnp.transpose(xp, (0, 4, 1, 2, 3))        # (S, Cin, N, Hp, Wp)
        wins = []
        for pi in range(ph):
            for pj in range(pw):
                taps = []
                for ki in range(kh):
                    for kj in range(kw):
                        sl = xcf[:, :, :,
                                 pi + ki: pi + ki + Hq * ph: ph,
                                 pj + kj: pj + kj + Wq * pw: pw]
                        taps.append(sl.reshape(S, cin, Mq))
                wins.append(jnp.concatenate(taps, axis=1))        # (S, K, Mq)
        patches = jnp.stack(wins, axis=1).astype(jnp.bfloat16)    # (S,P,K,Mq)
        out = _conv_group_call(patches, group_params["w"],
                               group_params["shift"],
                               transposed=True)                   # (S,Cout,Mq)
        y = out.reshape(S, cout, N, Hq, Wq)
        y = jnp.transpose(y, (0, 2, 3, 4, 1))                     # back to NHWC
    else:
        wins = []
        for pi in range(ph):
            for pj in range(pw):
                taps = []
                for ki in range(kh):
                    for kj in range(kw):
                        sl = xp[:, :,
                                pi + ki: pi + ki + Hq * ph: ph,
                                pj + kj: pj + kj + Wq * pw: pw, :]
                        taps.append(sl)
                wins.append(jnp.concatenate(taps, axis=-1).reshape(S, Mq, K))
        patches = jnp.stack(wins, axis=1).astype(jnp.bfloat16)    # (S,P,Mq,K)
        out = _conv_group_call(patches, group_params["w"],
                               group_params["shift"],
                               transposed=False)                  # (S,Mq,Cout)
        y = out.reshape(S, N, Hq, Wq, cout)
    return y


# ----------------------------------------------------------------------------
# Parameter init (deterministic, synthetic): two independent ImageNet stacks
# (azi, ele) stacked on axis 0.  BN (inference) is folded: the per-channel
# scale is multiplied into the conv weights, the shift stays as a bias.
# ----------------------------------------------------------------------------
def init_params(key):
    params = []
    for (cin, cout, (kh, kw), _pool, transposed) in _GROUP_CFGS:
        wmats, shifts = [], []
        for _stream in range(2):
            key, kw_key, kb_key = jax.random.split(key, 3)
            w = jax.random.normal(kw_key, (kh, kw, cin, cout), jnp.float32) * 0.05
            b = jax.random.normal(kb_key, (cout,), jnp.float32) * 0.05
            i = jnp.arange(cout, dtype=jnp.float32)
            gamma = 1.0 + 0.01 * i
            beta = 0.005 * i
            run_mean = 0.002 * i
            run_var = 1.0 + 0.001 * i
            s = gamma / jnp.sqrt(run_var + 1e-5)       # BN (inference) scale
            shift = s * (b - run_mean) + beta          # BN (inference) shift
            w_folded = w * s                           # fold scale into weights
            wmat = w_folded.reshape(kh * kw * cin, cout)  # K rows in (ki,kj,cin)
            if transposed:
                wmat = wmat.T                          # (Cout, K)
                shift = shift.reshape(cout, 1)
            else:
                shift = shift.reshape(1, cout)
            wmats.append(wmat.astype(jnp.bfloat16))
            shifts.append(shift)
        params.append({
            "w": jnp.stack(wmats, axis=0),
            "shift": jnp.stack(shifts, axis=0),
        })
    return params


# ----------------------------------------------------------------------------
# Forward pass: ImageDualNet_Single_v1
# ----------------------------------------------------------------------------
def image_dual_net_single_v1_forward(params, azi_nchw, ele_nchw):
    N = azi_nchw.shape[0]
    azi = jnp.transpose(azi_nchw, (0, 2, 3, 1)).astype(jnp.float32)   # -> NHWC
    ele = jnp.transpose(ele_nchw, (0, 2, 3, 1)).astype(jnp.float32)
    x = jnp.stack([azi, ele], axis=0)                                 # (2,N,H,W,1)

    feats = []
    y = x
    for group_params, cfg in zip(params, _GROUP_CFGS):
        y = _conv_group(y, group_params, cfg)
        feats.append(y)

    # TODO(synk): the provided ImageNet.forward returns a single tensor, but
    # ImageDualNet_Single_v1 unpacks 4 values per stream; we expose the outputs
    # of groups 2..5 as (g1..g4), so g4 is the final feature used for out_azi.
    picked = feats[1:]

    gs = []
    for f in picked:                                    # f: (2, N, Hq, Wq, C)
        f_nchw = jnp.transpose(f, (0, 1, 4, 2, 3))      # (2, N, C, H, W)
        gs.append(jnp.concatenate([f_nchw[0], f_nchw[1]], axis=1))  # cat dim=1

    g_last = feats[-1]                                  # (2, N, 2, 4, 128)
    # flatten in (C, H, W) order to match torch `.view(N, -1)` on NCHW tensors
    out_azi = jnp.transpose(g_last[0], (0, 3, 1, 2)).reshape(N, -1)
    out_ele = jnp.transpose(g_last[1], (0, 3, 1, 2)).reshape(N, -1)
    return out_azi, out_ele, tuple(gs)


# ----------------------------------------------------------------------------
if __name__ == "__main__":
    batch = 2
    H, W = 46, 16   # gives final per-stream feature map (128, 2, 4)

    root = jax.random.PRNGKey(0)
    k_params, k_azi, k_ele = jax.random.split(root, 3)
    params = init_params(k_params)

    azi = jax.random.normal(k_azi, (batch, 1, H, W), jnp.float32)   # NCHW
    ele = jax.random.normal(k_ele, (batch, 1, H, W), jnp.float32)   # NCHW

    fwd = jax.jit(image_dual_net_single_v1_forward)
    out_azi, out_ele, (g1, g2, g3, g4) = fwd(params, azi, ele)
    jax.block_until_ready((out_azi, out_ele, g1, g2, g3, g4))

    assert out_azi.shape == (batch, 128 * 2 * 4), out_azi.shape
    assert out_ele.shape == (batch, 128 * 2 * 4), out_ele.shape
    assert g1.shape == (batch, 64, 10, 8), g1.shape
    assert g2.shape == (batch, 128, 4, 8), g2.shape
    assert g3.shape == (batch, 256, 2, 4), g3.shape
    assert g4.shape == (batch, 256, 2, 4), g4.shape
    print("KERNEL_OK")
</pallas_src>

<mosaic_0001>
module attributes {stable_mosaic.version = 11 : i64} {
  func.func @_conv_bn_relu_pool_kernel(%arg0: i32, %arg1: memref<1x2x15x704xbf16, #tpu.memory_space<vmem>>, %arg2: memref<1x16x15xbf16, #tpu.memory_space<vmem>>, %arg3: memref<1x16x1xf32, #tpu.memory_space<vmem>>, %arg4: memref<1x16x704xf32, #tpu.memory_space<vmem>>) attributes {dimension_semantics = [#tpu.dimension_semantics<parallel>], iteration_bounds = array<i64: 2>, scalar_prefetch = 0 : i64, scratch_operands = 0 : i64, tpu.core_type = #tpu.core_type<tc>, window_params = [{transform_indices = @transform_0, window_bounds = array<i64: 1, 2, 15, 704>}, {transform_indices = @transform_1, window_bounds = array<i64: 1, 16, 15>}, {transform_indices = @transform_2, window_bounds = array<i64: 1, 16, 1>}, {transform_indices = @transform_3, window_bounds = array<i64: 1, 16, 704>}]} {
    %c0 = arith.constant 0 : index
    %c0_0 = arith.constant 0 : index
    %c0_1 = arith.constant 0 : index
    %0 = vector.load %arg2[%c0, %c0_0, %c0_1] : memref<1x16x15xbf16, #tpu.memory_space<vmem>>, vector<1x16x15xbf16>
    %1 = vector.shape_cast %0 : vector<1x16x15xbf16> to vector<16x15xbf16>
    %c0_2 = arith.constant 0 : index
    %c0_3 = arith.constant 0 : index
    %c0_4 = arith.constant 0 : index
    %c0_5 = arith.constant 0 : index
    %2 = vector.load %arg1[%c0_2, %c0_3, %c0_4, %c0_5] : memref<1x2x15x704xbf16, #tpu.memory_space<vmem>>, vector<1x1x15x704xbf16>
    %3 = vector.shape_cast %2 : vector<1x1x15x704xbf16> to vector<15x704xbf16>
    %cst = arith.constant dense<0.000000e+00> : vector<16x704xf32>
    %4 = tpu.matmul %1, %3, %cst {dimension_numbers = #tpu.dot_dimension_numbers<[1], [0], [0], [1], [0, 0, 1, 1], [], []>} : vector<16x15xbf16>, vector<15x704xbf16>, vector<16x704xf32> -> vector<16x704xf32>
    %c0_6 = arith.constant 0 : index
    %c1 = arith.constant 1 : index
    %c0_7 = arith.constant 0 : index
    %c0_8 = arith.constant 0 : index
    %5 = vector.load %arg1[%c0_6, %c1, %c0_7, %c0_8] : memref<1x2x15x704xbf16, #tpu.memory_space<vmem>>, vector<1x1x15x704xbf16>
    %6 = vector.shape_cast %5 : vector<1x1x15x704xbf16> to vector<15x704xbf16>
    %cst_9 = arith.constant dense<0.000000e+00> : vector<16x704xf32>
    %7 = tpu.matmul %1, %6, %cst_9 {dimension_numbers = #tpu.dot_dimension_numbers<[1], [0], [0], [1], [0, 0, 1, 1], [], []>} : vector<16x15xbf16>, vector<15x704xbf16>, vector<16x704xf32> -> vector<16x704xf32>
    %8 = arith.maximumf %4, %7 : vector<16x704xf32>
    %c0_10 = arith.constant 0 : index
    %c0_11 = arith.constant 0 : index
    %c0_12 = arith.constant 0 : index
    %9 = vector.load %arg3[%c0_10, %c0_11, %c0_12] : memref<1x16x1xf32, #tpu.memory_space<vmem>>, vector<1x16x1xf32>
    %10 = vector.shape_cast %9 : vector<1x16x1xf32> to vector<16x1xf32>
    %11 = vector.broadcast %10 : vector<16x1xf32> to vector<16x704xf32>
    %12 = arith.addf %8, %11 : vector<16x704xf32>
    %cst_13 = arith.constant 0.000000e+00 : f32
    %13 = vector.broadcast %cst_13 : f32 to vector<16x704xf32>
    %14 = arith.maximumf %12, %13 : vector<16x704xf32>
    %c0_14 = arith.constant 0 : index
    %c0_15 = arith.constant 0 : index
    %c0_16 = arith.constant 0 : index
    %15 = vector.load %arg4[%c0_14, %c0_15, %c0_16] : memref<1x16x704xf32, #tpu.memory_space<vmem>>, vector<1x16x704xf32>
    %16 = vector.shape_cast %15 : vector<1x16x704xf32> to vector<16x704xf32>
    %17 = vector.shape_cast %14 : vector<16x704xf32> to vector<1x16x704xf32>
    tpu.vector_store %arg4[%c0_14, %c0_15, %c0_16], %17 {strides = array<i32>} : memref<1x16x704xf32, #tpu.memory_space<vmem>>, vector<1x16x704xf32>,
    return
  }
  func.func @transform_0(%arg0: i32) -> (i32, i32, i32, i32) {
    %c0_i32 = arith.constant 0 : i32
    %c0_i32_0 = arith.constant 0 : i32
    %c0_i32_1 = arith.constant 0 : i32
    %c0_i32_2 = arith.constant 0 : i32
    return %arg0, %c0_i32, %c0_i32_0, %c0_i32_1 : i32, i32, i32, i32
  }
  func.func @transform_1(%arg0: i32) -> (i32, i32, i32) {
    %c0_i32 = arith.constant 0 : i32
    %c0_i32_0 = arith.constant 0 : i32
    %c0_i32_1 = arith.constant 0 : i32
    return %arg0, %c0_i32, %c0_i32_0 : i32, i32, i32
  }
  func.func @transform_2(%arg0: i32) -> (i32, i32, i32) {
    %c0_i32 = arith.constant 0 : i32
    %c0_i32_0 = arith.constant 0 : i32
    %c0_i32_1 = arith.constant 0 : i32
    return %arg0, %c0_i32, %c0_i32_0 : i32, i32, i32
  }
  func.func @transform_3(%arg0: i32) -> (i32, i32, i32) {
    %c0_i32 = arith.constant 0 : i32
    %c0_i32_0 = arith.constant 0 : i32
    %c0_i32_1 = arith.constant 0 : i32
    return %arg0, %c0_i32, %c0_i32_0 : i32, i32, i32
  }
}

module attributes {stable_mosaic.version = 11 : i64} {
  func.func @_conv_bn_relu_pool_kernel(%arg0: i32, %arg1: memref<1x4x240x160xbf16, #tpu.memory_space<vmem>>, %arg2: memref<1x32x240xbf16, #tpu.memory_space<vmem>>, %arg3: memref<1x32x1xf32, #tpu.memory_space<vmem>>, %arg4: memref<1x32x160xf32, #tpu.memory_space<vmem>>) attributes {dimension_semantics = [#tpu.dimension_semantics<parallel>], iteration_bounds = array<i64: 2>, scalar_prefetch = 0 : i64, scratch_operands = 0 : i64, tpu.core_type = #tpu.core_type<tc>, window_params = [{transform_indices = @transform_0, window_bounds = array<i64: 1, 4, 240, 160>}, {transform_indices = @transform_1, window_bounds = array<i64: 1, 32, 240>}, {transform_indices = @transform_2, window_bounds = array<i64: 1, 32, 1>}, {transform_indices = @transform_3, window_bounds = array<i64: 1, 32, 160>}]} {
    %c0 = arith.constant 0 : index
    %c0_0 = arith.constant 0 : index
    %c0_1 = arith.constant 0 : index
    %0 = vector.load %arg2[%c0, %c0_0, %c0_1] : memref<1x32x240xbf16, #tpu.memory_space<vmem>>, vector<1x32x240xbf16>
    %1 = vector.shape_cast %0 : vector<1x32x240xbf16> to vector<32x240xbf16>
    %c0_2 = arith.constant 0 : index
    %c0_3 = arith.constant 0 : index
    %c0_4 = arith.constant 0 : index
    %c0_5 = arith.constant 0 : index
    %2 = vector.load %arg1[%c0_2, %c0_3, %c0_4, %c0_5] : memref<1x4x240x160xbf16, #tpu.memory_space<vmem>>, vector<1x1x240x160xbf16>
    %3 = vector.shape_cast %2 : vector<1x1x240x160xbf16> to vector<240x160xbf16>
    %cst = arith.constant dense<0.000000e+00> : vector<32x160xf32>
    %4 = tpu.matmul %1, %3, %cst {dimension_numbers = #tpu.dot_dimension_numbers<[1], [0], [0], [1], [0, 0, 1, 1], [], []>} : vector<32x240xbf16>, vector<240x160xbf16>, vector<32x160xf32> -> vector<32x160xf32>
    %c0_6 = arith.constant 0 : index
    %c1 = arith.constant 1 : index
    %c0_7 = arith.constant 0 : index
    %c0_8 = arith.constant 0 : index
    %5 = vector.load %arg1[%c0_6, %c1, %c0_7, %c0_8] : memref<1x4x240x160xbf16, #tpu.memory_space<vmem>>, vector<1x1x240x160xbf16>
    %6 = vector.shape_cast %5 : vector<1x1x240x160xbf16> to vector<240x160xbf16>
    %cst_9 = arith.constant dense<0.000000e+00> : vector<32x160xf32>
    %7 = tpu.matmul %1, %6, %cst_9 {dimension_numbers = #tpu.dot_dimension_numbers<[1], [0], [0], [1], [0, 0, 1, 1], [], []>} : vector<32x240xbf16>, vector<240x160xbf16>, vector<32x160xf32> -> vector<32x160xf32>
    %c0_10 = arith.constant 0 : index
    %c2 = arith.constant 2 : index
    %c0_11 = arith.constant 0 : index
    %c0_12 = arith.constant 0 : index
    %8 = vector.load %arg1[%c0_10, %c2, %c0_11, %c0_12] : memref<1x4x240x160xbf16, #tpu.memory_space<vmem>>, vector<1x1x240x160xbf16>
    %9 = vector.shape_cast %8 : vector<1x1x240x160xbf16> to vector<240x160xbf16>
    %cst_13 = arith.constant dense<0.000000e+00> : vector<32x160xf32>
    %10 = tpu.matmul %1, %9, %cst_13 {dimension_numbers = #tpu.dot_dimension_numbers<[1], [0], [0], [1], [0, 0, 1, 1], [], []>} : vector<32x240xbf16>, vector<240x160xbf16>, vector<32x160xf32> -> vector<32x160xf32>
    %c0_14 = arith.constant 0 : index
    %c3 = arith.constant 3 : index
    %c0_15 = arith.constant 0 : index
    %c0_16 = arith.constant 0 : index
    %11 = vector.load %arg1[%c0_14, %c3, %c0_15, %c0_16] : memref<1x4x240x160xbf16, #tpu.memory_space<vmem>>, vector<1x1x240x160xbf16>
    %12 = vector.shape_cast %11 : vector<1x1x240x160xbf16> to vector<240x160xbf16>
    %cst_17 = arith.constant dense<0.000000e+00> : vector<32x160xf32>
    %13 = tpu.matmul %1, %12, %cst_17 {dimension_numbers = #tpu.dot_dimension_numbers<[1], [0], [0], [1], [0, 0, 1, 1], [], []>} : vector<32x240xbf16>, vector<240x160xbf16>, vector<32x160xf32> -> vector<32x160xf32>
    %14 = arith.maximumf %4, %7 : vector<32x160xf32>
    %15 = arith.maximumf %10, %13 : vector<32x160xf32>
    %16 = arith.maximumf %14, %15 : vector<32x160xf32>
    %c0_18 = arith.constant 0 : index
    %c0_19 = arith.constant 0 : index
    %c0_20 = arith.constant 0 : index
    %17 = vector.load %arg3[%c0_18, %c0_19, %c0_20] : memref<1x32x1xf32, #tpu.memory_space<vmem>>, vector<1x32x1xf32>
    %18 = vector.shape_cast %17 : vector<1x32x1xf32> to vector<32x1xf32>
    %19 = vector.broadcast %18 : vector<32x1xf32> to vector<32x160xf32>
    %20 = arith.addf %16, %19 : vector<32x160xf32>
    %cst_21 = arith.constant 0.000000e+00 : f32
    %21 = vector.broadcast %cst_21 : f32 to vector<32x160xf32>
    %22 = arith.maximumf %20, %21 : vector<32x160xf32>
    %c0_22 = arith.constant 0 : index
    %c0_23 = arith.constant 0 : index
    %c0_24 = arith.constant 0 : index
    %23 = vector.load %arg4[%c0_22, %c0_23, %c0_24] : memref<1x32x160xf32, #tpu.memory_space<vmem>>, vector<1x32x160xf32>
    %24 = vector.shape_cast %23 : vector<1x32x160xf32> to vector<32x160xf32>
    %25 = vector.shape_cast %22 : vector<32x160xf32> to vector<1x32x160xf32>
    tpu.vector_store %arg4[%c0_22, %c0_23, %c0_24], %25 {strides = array<i32>} : memref<1x32x160xf32, #tpu.memory_space<vmem>>, vector<1x32x160xf32>,
    return
  }
  func.func @transform_0(%arg0: i32) -> (i32, i32, i32, i32) {
    %c0_i32 = arith.constant 0 : i32
    %c0_i32_0 = arith.constant 0 : i32
    %c0_i32_1 = arith.constant 0 : i32
    %c0_i32_2 = arith.constant 0 : i32
    return %arg0, %c0_i32, %c0_i32_0, %c0_i32_1 : i32, i32, i32, i32
  }
  func.func @transform_1(%arg0: i32) -> (i32, i32, i32) {
    %c0_i32 = arith.constant 0 : i32
    %c0_i32_0 = arith.constant 0 : i32
    %c0_i32_1 = arith.constant 0 : i32
    return %arg0, %c0_i32, %c0_i32_0 : i32, i32, i32
  }
  func.func @transform_2(%arg0: i32) -> (i32, i32, i32) {
    %c0_i32 = arith.constant 0 : i32
    %c0_i32_0 = arith.constant 0 : i32
    %c0_i32_1 = arith.constant 0 : i32
    return %arg0, %c0_i32, %c0_i32_0 : i32, i32, i32
  }
  func.func @transform_3(%arg0: i32) -> (i32, i32, i32) {
    %c0_i32 = arith.constant 0 : i32
    %c0_i32_0 = arith.constant 0 : i32
    %c0_i32_1 = arith.constant 0 : i32
    return %arg0, %c0_i32, %c0_i32_0 : i32, i32, i32
  }
}

module attributes {stable_mosaic.version = 11 : i64} {
  func.func @_conv_bn_relu_pool_kernel(%arg0: i32, %arg1: memref<1x2x480x64xbf16, #tpu.memory_space<vmem>>, %arg2: memref<1x64x480xbf16, #tpu.memory_space<vmem>>, %arg3: memref<1x64x1xf32, #tpu.memory_space<vmem>>, %arg4: memref<1x64x64xf32, #tpu.memory_space<vmem>>) attributes {dimension_semantics = [#tpu.dimension_semantics<parallel>], iteration_bounds = array<i64: 2>, scalar_prefetch = 0 : i64, scratch_operands = 0 : i64, tpu.core_type = #tpu.core_type<tc>, window_params = [{transform_indices = @transform_0, window_bounds = array<i64: 1, 2, 480, 64>}, {transform_indices = @transform_1, window_bounds = array<i64: 1, 64, 480>}, {transform_indices = @transform_2, window_bounds = array<i64: 1, 64, 1>}, {transform_indices = @transform_3, window_bounds = array<i64: 1, 64, 64>}]} {
    %c0 = arith.constant 0 : index
    %c0_0 = arith.constant 0 : index
    %c0_1 = arith.constant 0 : index
    %0 = vector.load %arg2[%c0, %c0_0, %c0_1] : memref<1x64x480xbf16, #tpu.memory_space<vmem>>, vector<1x64x480xbf16>
    %1 = vector.shape_cast %0 : vector<1x64x480xbf16> to vector<64x480xbf16>
    %c0_2 = arith.constant 0 : index
    %c0_3 = arith.constant 0 : index
    %c0_4 = arith.constant 0 : index
    %c0_5 = arith.constant 0 : index
    %2 = vector.load %arg1[%c0_2, %c0_3, %c0_4, %c0_5] : memref<1x2x480x64xbf16, #tpu.memory_space<vmem>>, vector<1x1x480x64xbf16>
    %3 = vector.shape_cast %2 : vector<1x1x480x64xbf16> to vector<480x64xbf16>
    %cst = arith.constant dense<0.000000e+00> : vector<64x64xf32>
    %4 = tpu.matmul %1, %3, %cst {dimension_numbers = #tpu.dot_dimension_numbers<[1], [0], [0], [1], [0, 0, 1, 1], [], []>} : vector<64x480xbf16>, vector<480x64xbf16>, vector<64x64xf32> -> vector<64x64xf32>
    %c0_6 = arith.constant 0 : index
    %c1 = arith.constant 1 : index
    %c0_7 = arith.constant 0 : index
    %c0_8 = arith.constant 0 : index
    %5 = vector.load %arg1[%c0_6, %c1, %c0_7, %c0_8] : memref<1x2x480x64xbf16, #tpu.memory_space<vmem>>, vector<1x1x480x64xbf16>
    %6 = vector.shape_cast %5 : vector<1x1x480x64xbf16> to vector<480x64xbf16>
    %cst_9 = arith.constant dense<0.000000e+00> : vector<64x64xf32>
    %7 = tpu.matmul %1, %6, %cst_9 {dimension_numbers = #tpu.dot_dimension_numbers<[1], [0], [0], [1], [0, 0, 1, 1], [], []>} : vector<64x480xbf16>, vector<480x64xbf16>, vector<64x64xf32> -> vector<64x64xf32>
    %8 = arith.maximumf %4, %7 : vector<64x64xf32>
    %c0_10 = arith.constant 0 : index
    %c0_11 = arith.constant 0 : index
    %c0_12 = arith.constant 0 : index
    %9 = vector.load %arg3[%c0_10, %c0_11, %c0_12] : memref<1x64x1xf32, #tpu.memory_space<vmem>>, vector<1x64x1xf32>
    %10 = vector.shape_cast %9 : vector<1x64x1xf32> to vector<64x1xf32>
    %11 = vector.broadcast %10 : vector<64x1xf32> to vector<64x64xf32>
    %12 = arith.addf %8, %11 : vector<64x64xf32>
    %cst_13 = arith.constant 0.000000e+00 : f32
    %13 = vector.broadcast %cst_13 : f32 to vector<64x64xf32>
    %14 = arith.maximumf %12, %13 : vector<64x64xf32>
    %c0_14 = arith.constant 0 : index
    %c0_15 = arith.constant 0 : index
    %c0_16 = arith.constant 0 : index
    %15 = vector.load %arg4[%c0_14, %c0_15, %c0_16] : memref<1x64x64xf32, #tpu.memory_space<vmem>>, vector<1x64x64xf32>
    %16 = vector.shape_cast %15 : vector<1x64x64xf32> to vector<64x64xf32>
    %17 = vector.shape_cast %14 : vector<64x64xf32> to vector<1x64x64xf32>
    tpu.vector_store %arg4[%c0_14, %c0_15, %c0_16], %17 {strides = array<i32>} : memref<1x64x64xf32, #tpu.memory_space<vmem>>, vector<1x64x64xf32>,
    return
  }
  func.func @transform_0(%arg0: i32) -> (i32, i32, i32, i32) {
    %c0_i32 = arith.constant 0 : i32
    %c0_i32_0 = arith.constant 0 : i32
    %c0_i32_1 = arith.constant 0 : i32
    %c0_i32_2 = arith.constant 0 : i32
    return %arg0, %c0_i32, %c0_i32_0, %c0_i32_1 : i32, i32, i32, i32
  }
  func.func @transform_1(%arg0: i32) -> (i32, i32, i32) {
    %c0_i32 = arith.constant 0 : i32
    %c0_i32_0 = arith.constant 0 : i32
    %c0_i32_1 = arith.constant 0 : i32
    return %arg0, %c0_i32, %c0_i32_0 : i32, i32, i32
  }
  func.func @transform_2(%arg0: i32) -> (i32, i32, i32) {
    %c0_i32 = arith.constant 0 : i32
    %c0_i32_0 = arith.constant 0 : i32
    %c0_i32_1 = arith.constant 0 : i32
    return %arg0, %c0_i32, %c0_i32_0 : i32, i32, i32
  }
  func.func @transform_3(%arg0: i32) -> (i32, i32, i32) {
    %c0_i32 = arith.constant 0 : i32
    %c0_i32_0 = arith.constant 0 : i32
    %c0_i32_1 = arith.constant 0 : i32
    return %arg0, %c0_i32, %c0_i32_0 : i32, i32, i32
  }
}

module attributes {stable_mosaic.version = 11 : i64} {
  func.func @_conv_bn_relu_pool_kernel(%arg0: i32, %arg1: memref<1x1x16x1152xbf16, #tpu.memory_space<vmem>>, %arg2: memref<1x1152x128xbf16, #tpu.memory_space<vmem>>, %arg3: memref<1x1x128xf32, #tpu.memory_space<vmem>>, %arg4: memref<1x16x128xf32, #tpu.memory_space<vmem>>) attributes {dimension_semantics = [#tpu.dimension_semantics<parallel>], iteration_bounds = array<i64: 2>, scalar_prefetch = 0 : i64, scratch_operands = 0 : i64, tpu.core_type = #tpu.core_type<tc>, window_params = [{transform_indices = @transform_0, window_bounds = array<i64: 1, 1, 16, 1152>}, {transform_indices = @transform_1, window_bounds = array<i64: 1, 1152, 128>}, {transform_indices = @transform_2, window_bounds = array<i64: 1, 1, 128>}, {transform_indices = @transform_3, window_bounds = array<i64: 1, 16, 128>}]} {
    %c0 = arith.constant 0 : index
    %c0_0 = arith.constant 0 : index
    %c0_1 = arith.constant 0 : index
    %0 = vector.load %arg2[%c0, %c0_0, %c0_1] : memref<1x1152x128xbf16, #tpu.memory_space<vmem>>, vector<1x1152x128xbf16>
    %1 = vector.shape_cast %0 : vector<1x1152x128xbf16> to vector<1152x128xbf16>
    %c0_2 = arith.constant 0 : index
    %c0_3 = arith.constant 0 : index
    %c0_4 = arith.constant 0 : index
    %c0_5 = arith.constant 0 : index
    %2 = vector.load %arg1[%c0_2, %c0_3, %c0_4, %c0_5] : memref<1x1x16x1152xbf16, #tpu.memory_space<vmem>>, vector<1x1x16x1152xbf16>
    %3 = vector.shape_cast %2 : vector<1x1x16x1152xbf16> to vector<16x1152xbf16>
    %cst = arith.constant dense<0.000000e+00> : vector<16x128xf32>
    %4 = tpu.matmul %3, %1, %cst {dimension_numbers = #tpu.dot_dimension_numbers<[1], [0], [0], [1], [0, 0, 1, 1], [], []>} : vector<16x1152xbf16>, vector<1152x128xbf16>, vector<16x128xf32> -> vector<16x128xf32>
    %c0_6 = arith.constant 0 : index
    %c0_7 = arith.constant 0 : index
    %c0_8 = arith.constant 0 : index
    %5 = vector.load %arg3[%c0_6, %c0_7, %c0_8] : memref<1x1x128xf32, #tpu.memory_space<vmem>>, vector<1x1x128xf32>
    %6 = vector.shape_cast %5 : vector<1x1x128xf32> to vector<1x128xf32>
    %7 = vector.broadcast %6 : vector<1x128xf32> to vector<16x128xf32>
    %8 = arith.addf %4, %7 : vector<16x128xf32>
    %cst_9 = arith.constant 0.000000e+00 : f32
    %9 = vector.broadcast %cst_9 : f32 to vector<16x128xf32>
    %10 = arith.maximumf %8, %9 : vector<16x128xf32>
    %c0_10 = arith.constant 0 : index
    %c0_11 = arith.constant 0 : index
    %c0_12 = arith.constant 0 : index
    %11 = vector.load %arg4[%c0_10, %c0_11, %c0_12] : memref<1x16x128xf32, #tpu.memory_space<vmem>>, vector<1x16x128xf32>
    %12 = vector.shape_cast %11 : vector<1x16x128xf32> to vector<16x128xf32>
    %13 = vector.shape_cast %10 : vector<16x128xf32> to vector<1x16x128xf32>
    tpu.vector_store %arg4[%c0_10, %c0_11, %c0_12], %13 {strides = array<i32>} : memref<1x16x128xf32, #tpu.memory_space<vmem>>, vector<1x16x128xf32>,
    return
  }
  func.func @transform_0(%arg0: i32) -> (i32, i32, i32, i32) {
    %c0_i32 = arith.constant 0 : i32
    %c0_i32_0 = arith.constant 0 : i32
    %c0_i32_1 = arith.constant 0 : i32
    %c0_i32_2 = arith.constant 0 : i32
    return %arg0, %c0_i32, %c0_i32_0, %c0_i32_1 : i32, i32, i32, i32
  }
  func.func @transform_1(%arg0: i32) -> (i32, i32, i32) {
    %c0_i32 = arith.constant 0 : i32
    %c0_i32_0 = arith.constant 0 : i32
    %c0_i32_1 = arith.constant 0 : i32
    return %arg0, %c0_i32, %c0_i32_0 : i32, i32, i32
  }
  func.func @transform_2(%arg0: i32) -> (i32, i32, i32) {
    %c0_i32 = arith.constant 0 : i32
    %c0_i32_0 = arith.constant 0 : i32
    %c0_i32_1 = arith.constant 0 : i32
    return %arg0, %c0_i32, %c0_i32_0 : i32, i32, i32
  }
  func.func @transform_3(%arg0: i32) -> (i32, i32, i32) {
    %c0_i32 = arith.constant 0 : i32
    %c0_i32_0 = arith.constant 0 : i32
    %c0_i32_1 = arith.constant 0 : i32
    return %arg0, %c0_i32, %c0_i32_0 : i32, i32, i32
  }
}

module attributes {stable_mosaic.version = 11 : i64} {
  func.func @_conv_bn_relu_pool_kernel(%arg0: i32, %arg1: memref<1x4x16x576xbf16, #tpu.memory_space<vmem>>, %arg2: memref<1x576x128xbf16, #tpu.memory_space<vmem>>, %arg3: memref<1x1x128xf32, #tpu.memory_space<vmem>>, %arg4: memref<1x16x128xf32, #tpu.memory_space<vmem>>) attributes {dimension_semantics = [#tpu.dimension_semantics<parallel>], iteration_bounds = array<i64: 2>, scalar_prefetch = 0 : i64, scratch_operands = 0 : i64, tpu.core_type = #tpu.core_type<tc>, window_params = [{transform_indices = @transform_0, window_bounds = array<i64: 1, 4, 16, 576>}, {transform_indices = @transform_1, window_bounds = array<i64: 1, 576, 128>}, {transform_indices = @transform_2, window_bounds = array<i64: 1, 1, 128>}, {transform_indices = @transform_3, window_bounds = array<i64: 1, 16, 128>}]} {
    %c0 = arith.constant 0 : index
    %c0_0 = arith.constant 0 : index
    %c0_1 = arith.constant 0 : index
    %0 = vector.load %arg2[%c0, %c0_0, %c0_1] : memref<1x576x128xbf16, #tpu.memory_space<vmem>>, vector<1x576x128xbf16>
    %1 = vector.shape_cast %0 : vector<1x576x128xbf16> to vector<576x128xbf16>
    %c0_2 = arith.constant 0 : index
    %c0_3 = arith.constant 0 : index
    %c0_4 = arith.constant 0 : index
    %c0_5 = arith.constant 0 : index
    %2 = vector.load %arg1[%c0_2, %c0_3, %c0_4, %c0_5] : memref<1x4x16x576xbf16, #tpu.memory_space<vmem>>, vector<1x1x16x576xbf16>
    %3 = vector.shape_cast %2 : vector<1x1x16x576xbf16> to vector<16x576xbf16>
    %cst = arith.constant dense<0.000000e+00> : vector<16x128xf32>
    %4 = tpu.matmul %3, %1, %cst {dimension_numbers = #tpu.dot_dimension_numbers<[1], [0], [0], [1], [0, 0, 1, 1], [], []>} : vector<16x576xbf16>, vector<576x128xbf16>, vector<16x128xf32> -> vector<16x128xf32>
    %c0_6 = arith.constant 0 : index
    %c1 = arith.constant 1 : index
    %c0_7 = arith.constant 0 : index
    %c0_8 = arith.constant 0 : index
    %5 = vector.load %arg1[%c0_6, %c1, %c0_7, %c0_8] : memref<1x4x16x576xbf16, #tpu.memory_space<vmem>>, vector<1x1x16x576xbf16>
    %6 = vector.shape_cast %5 : vector<1x1x16x576xbf16> to vector<16x576xbf16>
    %cst_9 = arith.constant dense<0.000000e+00> : vector<16x128xf32>
    %7 = tpu.matmul %6, %1, %cst_9 {dimension_numbers = #tpu.dot_dimension_numbers<[1], [0], [0], [1], [0, 0, 1, 1], [], []>} : vector<16x576xbf16>, vector<576x128xbf16>, vector<16x128xf32> -> vector<16x128xf32>
    %c0_10 = arith.constant 0 : index
    %c2 = arith.constant 2 : index
    %c0_11 = arith.constant 0 : index
    %c0_12 = arith.constant 0 : index
    %8 = vector.load %arg1[%c0_10, %c2, %c0_11, %c0_12] : memref<1x4x16x576xbf16, #tpu.memory_space<vmem>>, vector<1x1x16x576xbf16>
    %9 = vector.shape_cast %8 : vector<1x1x16x576xbf16> to vector<16x576xbf16>
    %cst_13 = arith.constant dense<0.000000e+00> : vector<16x128xf32>
    %10 = tpu.matmul %9, %1, %cst_13 {dimension_numbers = #tpu.dot_dimension_numbers<[1], [0], [0], [1], [0, 0, 1, 1], [], []>} : vector<16x576xbf16>, vector<576x128xbf16>, vector<16x128xf32> -> vector<16x128xf32>
    %c0_14 = arith.constant 0 : index
    %c3 = arith.constant 3 : index
    %c0_15 = arith.constant 0 : index
    %c0_16 = arith.constant 0 : index
    %11 = vector.load %arg1[%c0_14, %c3, %c0_15, %c0_16] : memref<1x4x16x576xbf16, #tpu.memory_space<vmem>>, vector<1x1x16x576xbf16>
    %12 = vector.shape_cast %11 : vector<1x1x16x576xbf16> to vector<16x576xbf16>
    %cst_17 = arith.constant dense<0.000000e+00> : vector<16x128xf32>
    %13 = tpu.matmul %12, %1, %cst_17 {dimension_numbers = #tpu.dot_dimension_numbers<[1], [0], [0], [1], [0, 0, 1, 1], [], []>} : vector<16x576xbf16>, vector<576x128xbf16>, vector<16x128xf32> -> vector<16x128xf32>
    %14 = arith.maximumf %4, %7 : vector<16x128xf32>
    %15 = arith.maximumf %10, %13 : vector<16x128xf32>
    %16 = arith.maximumf %14, %15 : vector<16x128xf32>
    %c0_18 = arith.constant 0 : index
    %c0_19 = arith.constant 0 : index
    %c0_20 = arith.constant 0 : index
    %17 = vector.load %arg3[%c0_18, %c0_19, %c0_20] : memref<1x1x128xf32, #tpu.memory_space<vmem>>, vector<1x1x128xf32>
    %18 = vector.shape_cast %17 : vector<1x1x128xf32> to vector<1x128xf32>
    %19 = vector.broadcast %18 : vector<1x128xf32> to vector<16x128xf32>
    %20 = arith.addf %16, %19 : vector<16x128xf32>
    %cst_21 = arith.constant 0.000000e+00 : f32
    %21 = vector.broadcast %cst_21 : f32 to vector<16x128xf32>
    %22 = arith.maximumf %20, %21 : vector<16x128xf32>
    %c0_22 = arith.constant 0 : index
    %c0_23 = arith.constant 0 : index
    %c0_24 = arith.constant 0 : index
    %23 = vector.load %arg4[%c0_22, %c0_23, %c0_24] : memref<1x16x128xf32, #tpu.memory_space<vmem>>, vector<1x16x128xf32>
    %24 = vector.shape_cast %23 : vector<1x16x128xf32> to vector<16x128xf32>
    %25 = vector.shape_cast %22 : vector<16x128xf32> to vector<1x16x128xf32>
    tpu.vector_store %arg4[%c0_22, %c0_23, %c0_24], %25 {strides = array<i32>} : memref<1x16x128xf32, #tpu.memory_space<vmem>>, vector<1x16x128xf32>,
    return
  }
  func.func @transform_0(%arg0: i32) -> (i32, i32, i32, i32) {
    %c0_i32 = arith.constant 0 : i32
    %c0_i32_0 = arith.constant 0 : i32
    %c0_i32_1 = arith.constant 0 : i32
    %c0_i32_2 = arith.constant 0 : i32
    return %arg0, %c0_i32, %c0_i32_0, %c0_i32_1 : i32, i32, i32, i32
  }
  func.func @transform_1(%arg0: i32) -> (i32, i32, i32) {
    %c0_i32 = arith.constant 0 : i32
    %c0_i32_0 = arith.constant 0 : i32
    %c0_i32_1 = arith.constant 0 : i32
    return %arg0, %c0_i32, %c0_i32_0 : i32, i32, i32
  }
  func.func @transform_2(%arg0: i32) -> (i32, i32, i32) {
    %c0_i32 = arith.constant 0 : i32
    %c0_i32_0 = arith.constant 0 : i32
    %c0_i32_1 = arith.constant 0 : i32
    return %arg0, %c0_i32, %c0_i32_0 : i32, i32, i32
  }
  func.func @transform_3(%arg0: i32) -> (i32, i32, i32) {
    %c0_i32 = arith.constant 0 : i32
    %c0_i32_0 = arith.constant 0 : i32
    %c0_i32_1 = arith.constant 0 : i32
    return %arg0, %c0_i32, %c0_i32_0 : i32, i32, i32
  }
}

</mosaic_0001>

<bundles_post_ra>
// kernel: image_dual_net_single_v1_forward.5
= control target key start
LH: loop header
LB: loop body
LE: loop exit
PB: predicated region body
PF: predicated region fallthrough
CT: control target
= control target key end

     0   :  { %s823_s12 = smov 0   ;;  %s891_s0 = inlined_call_operand.vmem [shape: bf16[2,2,15,704], index: 0, kind: input, shape index: {}]   ;;  %s892_s1 = inlined_call_operand.vmem [shape: bf16[2,16,15], index: 1, kind: input, shape index: {}]   ;;  %s893_s2 = inlined_call_operand.vmem [shape: f32[2,16,1], index: 2, kind: input, shape index: {}]   ;;  %s894_s3 = inlined_call_operand.vmem [shape: f32[2,16,704], index: 3, kind: output, shape index: {}]  }
   0x1 LB: > { %s722_s13 = sadd.s32 4294967295, %s799_s12   ;;  %p726_p0 = scmp.ge.s32.totalorder %s799_s12, 1  ;;  %s799_s12 = sphi %s823_s12, %s13_s12  }
   0x2   : > { %p157_p1 = scmp.lt.s32.totalorder %s799_s12, 3 }
   0x4   : > { %p158_p2 = pnand %p726_p0, %p157_p1 }
   0x5   : > { %p191_p3 = scmp.lt.s32.totalorder (!%p158_p2), %s722_s13, 1  ;;  %vm253_vm0 = vcmask (!%p158_p2), 1046528   ;;  %v801_v0 = vmov (!%p158_p2), 0   ;;  %vm254_vm1 = vcmask (!%p158_p2), 1047552   ;;  %v802_v1 = vmov (!%p158_p2), 65535  }
   0x6   : > { %161 = sbr.rel (%p158_p2) target bundleno = 263 (0x107), region = 32  ;;  %307 = vmatprep.mubr.bf16.mxu0 (!%p158_p2), %v801_v0  ;;  %350 = vmatprep.mubr.bf16.mxu1 (!%p158_p2), %v801_v0  ;;  %v255_v2 = vsel (!%p158_p2), %vm253_vm0, 4294967295, %v802_v1  ;;  %vm249_vm2 = vcmask (!%p158_p2), 121856   ;;  %vm635_vm3 = vcmask (!%p158_p2), 523264  }
   0x7   : > { %773 = vset.pattern.permute.xlu0 (!%p158_p2), %v801_v0  ;;  %v256_v3 = vsel (!%p158_p2), %vm254_vm1, %v255_v2, 0 }
   0xd   : > { %s896_s13 = smov (!%p191_p3, %s722_s13), 1 }
   0xe   : > { %s762_s14 = smul.u32 96, %s896_s13  ;;  %s760_s15 = sshll.u32 %s896_s13, 3 }
   0xf   : > { %s200_s18 = scalar_lea.vmem %s892_s1, %s760_s15  ;;  %s761_s22 = sshll.u32 %s896_s13, 4 }
  0x10   : > { %s843_s21 = scalar_lea.vmem %s891_s0, %s762_s14  ;;  %v780_v10 = vld [vmem:[%s200_s18] sm:$0xff]   ;;  %s205_s25 = scalar_lea.vmem %s893_s2, %s761_s22 }
  0x11   : > { %v774_v4 = vld [vmem:[%s843_s21 + $0x4] ss:$24 sps:$4 sm:$0xff]   ;;  %v778_v7 = vld [vmem:[%s843_s21] ss:$24 sps:$4 sm:$0xff]   ;;  %v781_v11 = vld [vmem:[%s843_s21 + $0x10] ss:$24 sps:$4 sm:$0xff]   ;;  %s872_s28 = scalar_lea.vmem %s894_s3, %s762_s14 }
  0x12   : > { %v776_v5 = vld [vmem:[%s843_s21 + $0xc] ss:$24 sps:$4 sm:$0xff]   ;;  %v261_v6 = vand.u32 %v774_v4, %v256_v3  ;;  %v779_v8 = vld [vmem:[%s843_s21 + $0x8] ss:$24 sps:$4 sm:$0xff]   ;;  %v258_v13 = vand.u32 %v778_v7, %v256_v3  ;;  %v270_v18 = vand.u32 %v781_v11, %v256_v3  ;;  %v789_v19 = vld [vmem:[%s843_s21 + $0x3c] ss:$24 sps:$4 sm:$0xff]  }
  0x13   : > { %v267_v9 = vand.u32 %v776_v5, %v256_v3  ;;  %v783_v12 = vld [vmem:[%s843_s21 + $0x14] ss:$24 sps:$4 sm:$0xff]   ;;  %v264_v14 = vand.u32 %v779_v8, %v256_v3  ;;  %v784_v15 = vld [vmem:[%s843_s21 + $0x30] ss:$24 sps:$4 sm:$0xff]   ;;  %v792_v22 = vld [vmem:[%s843_s21 + $0x44] ss:$24 sps:$4 sm:$0xff]   ;;  %v445_v23 = vand.u32 %v789_v19, %v256_v3 }
  0x14   : > { %275 = vmatprep.subr.bf16.mxu0 %v261_v6  ;;  %v273_v16 = vand.u32 %v783_v12, %v256_v3  ;;  %v786_v17 = vld [vmem:[%s843_s21 + $0x34] ss:$24 sps:$4 sm:$0xff]   ;;  %v436_v21 = vand.u32 %v784_v15, %v256_v3  ;;  %v451_v24 = vand.u32 %v792_v22, %v256_v3  ;;  %v787_v25 = vld [vmem:[%s843_s21 + $0x38] ss:$24 sps:$4 sm:$0xff]   ;;  %v594_v27 = vld [vmem:[%s205_s25] sm:$0xff] }
  0x15   : > { %318 = vmatprep.subr.bf16.mxu1 %v267_v9  ;;  %276 = vmatpush1.bf16.msra.mxu0 %v258_v13  ;;  %v439_v20 = vand.u32 %v786_v17, %v256_v3  ;;  %v790_v26 = vld [vmem:[%s843_s21 + $0x40] ss:$24 sps:$4 sm:$0xff]   ;;  %v442_v28 = vand.u32 %v787_v25, %v256_v3  ;;  %v595_v30 = vld [vmem:[%s205_s25 + $0x8] sm:$0xff] }
  0x16   : > { %319 = vmatpush1.bf16.msra.mxu1 %v264_v14  ;;  %361 = vmatprep.subr.bf16.mxu0 %v273_v16  ;;  %v448_v29 = vand.u32 %v790_v26, %v256_v3 }
  0x17   : > { %453 = vmatprep.subr.bf16.mxu1 %v439_v20  ;;  %598 = vperm.xlu0 %773, %v594_v27  }
  0x18   : > { %740 = vmatmul.mubr.msk.bf16.vlgmr.msra.gmra.mrb[0].mxu0 %vm249_vm2, %v780_v10 }
  0x19   : > { %741 = vmatmul.mubr.msk.bf16.vlgmr.msra.gmra.mrb[0].mxu1 %vm249_vm2, %v780_v10  ;;  %362 = vmatpush1.bf16.msra.mxu0 %v270_v18 }
  0x1a   : > { %454 = vmatpush1.bf16.msra.mxu1 %v436_v21  ;;  %393 = vmatprep.mubr.bf16.mxu0 %v801_v0 }
  0x1b   : > { %485 = vmatprep.mubr.bf16.mxu1 %v801_v0  ;;  %496 = vmatprep.subr.bf16.mxu0 %v445_v23 }
  0x1c   : > { %539 = vmatprep.subr.bf16.mxu1 %v451_v24  ;;  %603 = vperm.xlu0 %773, %v595_v30  }
  0x20   : > { %742 = vmatmul.mubr.msk.bf16.vlgmr.msra.gmra.mrb[4].mxu0 %vm249_vm2, %v780_v10 }
  0x21   : > { %755 = vmatmul.mubr.msk.bf16.vlgmr.msra.gmra.mrb[4].mxu1 %vm249_vm2, %v780_v10  ;;  %497 = vmatpush1.bf16.msra.mxu0 %v442_v28 }
  0x22   : > { %540 = vmatpush1.bf16.msra.mxu1 %v448_v29  ;;  %528 = vmatprep.mubr.bf16.mxu0 %v801_v0 }
  0x23   : > { %571 = vmatprep.mubr.bf16.mxu1 %v801_v0 }
  0x28   : > { %756 = vmatmul.mubr.msk.bf16.vlgmr.msra.gmra.mrb[8].mxu0 %vm249_vm2, %v780_v10 }
  0x29   : > { %757 = vmatmul.mubr.msk.bf16.vlgmr.msra.gmra.mrb[8].mxu1 %vm249_vm2, %v780_v10 }
  0x96   : > { %v599_v31 = vpop.permute.xlu0 %598 }
  0x9b   : > { %v604_v40 = vpop.permute.xlu0 %603 }
  0xeb   : > { %v309_v32 = vpop.f32.mrb[0].mxu0 }
  0xec   : > { %v352_v33 = vpop.f32.mrb[0].mxu1  ;;  %v311_v34 = vpop.f32.mrb[1].mxu0 }
  0xed   : > { %v354_v35 = vpop.f32.mrb[1].mxu1  ;;  %v313_v36 = vpop.f32.mrb[2].mxu0 }
  0xee   : > { %v356_v37 = vpop.f32.mrb[2].mxu1  ;;  %v315_v38 = vpop.f32.mrb[3].mxu0 }
  0xef   : > { %v358_v39 = vpop.f32.mrb[3].mxu1 }
  0xf3   : > { %v395_v41 = vpop.f32.mrb[4].mxu0 }
  0xf4   : > { %v487_v42 = vpop.f32.mrb[4].mxu1  ;;  %v397_v44 = vpop.f32.mrb[5].mxu0 }
  0xf5   : > { %v582_v43 = vmax.f32 %v309_v32, %v487_v42  ;;  %v489_v45 = vpop.f32.mrb[5].mxu1  ;;  %v399_v47 = vpop.f32.mrb[6].mxu0 }
  0xf6   : > { %v583_v46 = vmax.f32 %v311_v34, %v489_v45  ;;  %v491_v48 = vpop.f32.mrb[6].mxu1  ;;  %v401_v51 = vpop.f32.mrb[7].mxu0 }
  0xf7   : > { %v606_v49 = vadd.f32 %v599_v31, %v582_v43  ;;  %v588_v50 = vmax.f32 %v313_v36, %v491_v48  ;;  %v493_v52 = vpop.f32.mrb[7].mxu1 }
  0xf8   : > { %v607_v53 = vadd.f32 %v599_v31, %v583_v46  ;;  %v589_v54 = vmax.f32 %v315_v38, %v493_v52 }
  0xf9   : > { %v618_v55 = vmax.f32 %v606_v49, 0.0  ;;  %v612_v56 = vadd.f32 %v604_v40, %v588_v50 }
  0xfa   : > { %v619_v57 = vmax.f32 %v607_v53, 0.0  ;;  %v613_v58 = vadd.f32 %v604_v40, %v589_v54 }
  0xfb   : > { %630 = vst [vmem:[%s872_s28] sm:$0xff] %v618_v55  ;;  %v624_v59 = vmax.f32 %v612_v56, 0.0  ;;  %v530_v61 = vpop.f32.mrb[8].mxu0 }
  0xfc   : > { %631 = vst [vmem:[%s872_s28 + $0x8] sm:$0xff] %v619_v57  ;;  %v625_v60 = vmax.f32 %v613_v58, 0.0  ;;  %v573_v62 = vpop.f32.mrb[8].mxu1  ;;  %v584_v63 = vmax.f32 %v352_v33, %v530_v61  ;;  %v532_v1 = vpop.f32.mrb[9].mxu0 }
  0xfd   : > { %637 = vst [vmem:[%s872_s28 + $0x30] sm:$0xff] %v624_v59  ;;  %v586_v0 = vmax.f32 %v395_v41, %v573_v62  ;;  %v575_v2 = vpop.f32.mrb[9].mxu1  ;;  %v585_v3 = vmax.f32 %v354_v35, %v532_v1  ;;  %v534_v5 = vpop.f32.mrb[10].mxu0 }
  0xfe   : > { %638 = vst [vmem:[%s872_s28 + $0x38] sm:$0xff] %v625_v60  ;;  %v587_v4 = vmax.f32 %v397_v44, %v575_v2  ;;  %v577_v6 = vpop.f32.mrb[10].mxu1  ;;  %v608_v7 = vadd.f32 %v599_v31, %v584_v63  ;;  %v590_v9 = vmax.f32 %v356_v37, %v534_v5  ;;  %v536_v11 = vpop.f32.mrb[11].mxu0 }
  0xff   : > { %v610_v8 = vadd.f32 %v599_v31, %v586_v0  ;;  %v592_v10 = vmax.f32 %v399_v47, %v577_v6  ;;  %v579_v12 = vpop.f32.mrb[11].mxu1  ;;  %v609_v13 = vadd.f32 %v599_v31, %v585_v3  ;;  %v591_v15 = vmax.f32 %v358_v39, %v536_v11 }
 0x100   : > { %v611_v14 = vadd.f32 %v599_v31, %v587_v4  ;;  %v593_v16 = vmax.f32 %v401_v51, %v579_v12  ;;  %v620_v17 = vmax.f32 %v608_v7, 0.0  ;;  %v614_v19 = vadd.f32 %v604_v40, %v590_v9 }
 0x101   : > { %v622_v18 = vmax.f32 %v610_v8, 0.0  ;;  %v616_v20 = vadd.f32 %v604_v40, %v592_v10  ;;  %v621_v21 = vmax.f32 %v609_v13, 0.0  ;;  %v615_v23 = vadd.f32 %v604_v40, %v591_v15 }
 0x102   : > { %v623_v22 = vmax.f32 %v611_v14, 0.0  ;;  %v617_v24 = vadd.f32 %v604_v40, %v593_v16  ;;  %632 = vst [vmem:[%s872_s28 + $0x10] sm:$0xff] %v620_v17  ;;  %v626_v25 = vmax.f32 %v614_v19, 0.0 }
 0x103   : > { %634 = vst [vmem:[%s872_s28 + $0x20] sm:$0xff] %v622_v18  ;;  %v628_v26 = vmax.f32 %v616_v20, 0.0  ;;  %633 = vst [vmem:[%s872_s28 + $0x18] sm:$0xff] %v621_v21  ;;  %v627_v27 = vmax.f32 %v615_v23, 0.0 }
 0x104   : > { %636 = vst.msk [vmem:[%s872_s28 + $0x28] sm:$0xff] %vm635_vm3, %v623_v22  ;;  %v629_v28 = vmax.f32 %v617_v24, 0.0  ;;  %639 = vst [vmem:[%s872_s28 + $0x40] sm:$0xff] %v626_v25 }
 0x105   : > { %641 = vst [vmem:[%s872_s28 + $0x50] sm:$0xff] %v628_v26  ;;  %640 = vst [vmem:[%s872_s28 + $0x48] sm:$0xff] %v627_v27 }
 0x106   : > { %642 = vst.msk [vmem:[%s872_s28 + $0x58] sm:$0xff] %vm635_vm3, %v629_v28 }
 0x107 PF: > { %s13_s12 = sadd.s32 1, %s799_s12  }
 0x108   : > { %p10_p4 = scmp.ge.s32.totalorder %s13_s12, 4  }
 0x10a   :  { %12 = sbr.rel (!%p10_p4) target bundleno = 1 (0x1), region = 69 }

// kernel: image_dual_net_single_v1_forward.6
= control target key start
LH: loop header
LB: loop body
LE: loop exit
PB: predicated region body
PF: predicated region fallthrough
CT: control target
= control target key end

     0   :  { %s1794_s12 = smov 0   ;;  %s2000_s0 = inlined_call_operand.vmem [shape: bf16[2,4,240,160], index: 0, kind: input, shape index: {}]   ;;  %s2001_s1 = inlined_call_operand.vmem [shape: bf16[2,32,240], index: 1, kind: input, shape index: {}]   ;;  %s2002_s2 = inlined_call_operand.vmem [shape: f32[2,32,1], index: 2, kind: input, shape index: {}]   ;;  %s2003_s3 = inlined_call_operand.vmem [shape: f32[2,32,160], index: 3, kind: output, shape index: {}]  }
   0x1 LB: > { %s1328_s13 = sadd.s32 4294967295, %s1771_s12   ;;  %p1332_p0 = scmp.ge.s32.totalorder %s1771_s12, 1  ;;  %s1771_s12 = sphi %s1794_s12, %s13_s12  }
   0x2   : > { %p157_p1 = scmp.lt.s32.totalorder %s1771_s12, 3 }
   0x4   : > { %p158_p2 = pnand %p1332_p0, %p157_p1 }
   0x5   : > { %p191_p3 = scmp.lt.s32.totalorder (!%p158_p2), %s1328_s13, 1  ;;  %vm414_vm0 = vcmask (!%p158_p2), 916480   ;;  %v1773_v9 = vmov (!%p158_p2), 0   ;;  %vm1241_vm1 = vcmask (!%p158_p2), 261120  }
   0x6   : > { %161 = sbr.rel (%p158_p2) target bundleno = 370 (0x172), region = 32  ;;  %1577 = vset.pattern.permute.xlu0 (!%p158_p2), %v1773_v9  ;;  %1578 = vset.pattern.permute.xlu1 (!%p158_p2), %v1773_v9 }
   0xd   : > { %s2005_s13 = smov (!%p191_p3, %s1328_s13), 1 }
   0xe   : > { %s1567_s14 = smul.u32 960, %s2005_s13  ;;  %s1564_s15 = sshll.u32 %s2005_s13, 5 }
   0xf   : > { %s1811_s18 = scalar_lea.vmem %s2001_s1, %s1564_s15  ;;  %s205_s24 = scalar_lea.vmem %s2002_s2, %s1564_s15 }
  0x10   : > { %s1816_s21 = scalar_lea.vmem %s2000_s0, %s1567_s14  ;;  %v1819_v0 = vld [vmem:[%s1811_s18 + $0x4] ss:$8 sps:$4 sm:$0xff]   ;;  %s1566_s25 = sshll.u32 %s2005_s13, 6 }
  0x11   : > { %v1579_v1 = vld [vmem:[%s1816_s21 + $0x4] ss:$8 sps:$4 sm:$0xff]   ;;  %v1581_v2 = vld [vmem:[%s1816_s21 + $0xf4] ss:$8 sps:$4 sm:$0xff]   ;;  %1374 = vmatprep.mubr.msk.bf16.mxu0 %vm414_vm0, %v1819_v0  ;;  %1436 = vmatprep.mubr.msk.bf16.mxu1 %vm414_vm0, %v1819_v0  ;;  %v1583_v3 = vld [vmem:[%s1816_s21] ss:$8 sps:$4 sm:$0xff]   ;;  %s1983_s28 = scalar_lea.vmem %s2003_s3, %s1566_s25 }
  0x12   : > { %421 = vmatprep.subr.bf16.mxu0 %v1579_v1  ;;  %v1584_v4 = vld [vmem:[%s1816_s21 + $0xf0] ss:$8 sps:$4 sm:$0xff]   ;;  %655 = vmatprep.subr.bf16.mxu1 %v1581_v2  ;;  %v1585_v5 = vld [vmem:[%s1816_s21 + $0x14] ss:$8 sps:$4 sm:$0xff]   ;;  %v1587_v6 = vld [vmem:[%s1816_s21 + $0x104] ss:$8 sps:$4 sm:$0xff]  }
  0x13   : > { %422 = vmatpush1.bf16.msra.mxu0 %v1583_v3  ;;  %656 = vmatpush1.bf16.msra.mxu1 %v1584_v4  ;;  %v1589_v7 = vld [vmem:[%s1816_s21 + $0x10] ss:$8 sps:$4 sm:$0xff]   ;;  %v1590_v8 = vld [vmem:[%s1816_s21 + $0x100] ss:$8 sps:$4 sm:$0xff]   ;;  %v1591_v10 = vld [vmem:[%s1816_s21 + $0x24] ss:$8 sps:$4 sm:$0xff]  }
  0x14   : > { %423 = vmatprep.subr.bf16.mxu0 %v1585_v5  ;;  %657 = vmatprep.subr.bf16.mxu1 %v1587_v6  ;;  %v1593_v11 = vld [vmem:[%s1816_s21 + $0x114] ss:$8 sps:$4 sm:$0xff]   ;;  %v1595_v12 = vld [vmem:[%s1816_s21 + $0x20] ss:$8 sps:$4 sm:$0xff]   ;;  %v1596_v13 = vld [vmem:[%s1816_s21 + $0x110] ss:$8 sps:$4 sm:$0xff]  }
  0x15   : > { %v1597_v14 = vld [vmem:[%s1816_s21 + $0x34] ss:$8 sps:$4 sm:$0xff]   ;;  %v1599_v15 = vld [vmem:[%s1816_s21 + $0x124] ss:$8 sps:$4 sm:$0xff]   ;;  %v1601_v16 = vld [vmem:[%s1816_s21 + $0x30] ss:$8 sps:$4 sm:$0xff]  }
  0x16   : > { %v1602_v17 = vld [vmem:[%s1816_s21 + $0x120] ss:$8 sps:$4 sm:$0xff]   ;;  %v1603_v18 = vld [vmem:[%s1816_s21 + $0x44] ss:$8 sps:$4 sm:$0xff]   ;;  %v1605_v19 = vld [vmem:[%s1816_s21 + $0x134] ss:$8 sps:$4 sm:$0xff]  }
  0x17   : > { %424 = vmatpush1.bf16.msra.mxu0 %v1589_v7  ;;  %658 = vmatpush1.bf16.msra.mxu1 %v1590_v8  ;;  %v1607_v20 = vld [vmem:[%s1816_s21 + $0x40] ss:$8 sps:$4 sm:$0xff]   ;;  %v1608_v21 = vld [vmem:[%s1816_s21 + $0x130] ss:$8 sps:$4 sm:$0xff]   ;;  %v1609_v22 = vld [vmem:[%s1816_s21 + $0x54] ss:$8 sps:$4 sm:$0xff]  }
  0x18   : > { %425 = vmatprep.subr.bf16.mxu0 %v1591_v10  ;;  %659 = vmatprep.subr.bf16.mxu1 %v1593_v11  ;;  %v1611_v23 = vld [vmem:[%s1816_s21 + $0x144] ss:$8 sps:$4 sm:$0xff]   ;;  %v1613_v24 = vld [vmem:[%s1816_s21 + $0x50] ss:$8 sps:$4 sm:$0xff]   ;;  %v1614_v25 = vld [vmem:[%s1816_s21 + $0x140] ss:$8 sps:$4 sm:$0xff]  }
  0x19   : > { %v1615_v26 = vld [vmem:[%s1816_s21 + $0x64] ss:$8 sps:$4 sm:$0xff]   ;;  %v1617_v27 = vld [vmem:[%s1816_s21 + $0x154] ss:$8 sps:$4 sm:$0xff]   ;;  %v1619_v28 = vld [vmem:[%s1816_s21 + $0x60] ss:$8 sps:$4 sm:$0xff]  }
  0x1a   : > { %v1620_v29 = vld [vmem:[%s1816_s21 + $0x150] ss:$8 sps:$4 sm:$0xff]   ;;  %v1621_v30 = vld [vmem:[%s1816_s21 + $0x74] ss:$8 sps:$4 sm:$0xff]   ;;  %v1623_v31 = vld [vmem:[%s1816_s21 + $0x164] ss:$8 sps:$4 sm:$0xff]  }
  0x1b   : > { %426 = vmatpush1.bf16.msra.mxu0 %v1595_v12  ;;  %660 = vmatpush1.bf16.msra.mxu1 %v1596_v13  ;;  %v1625_v32 = vld [vmem:[%s1816_s21 + $0x70] ss:$8 sps:$4 sm:$0xff]   ;;  %v1626_v33 = vld [vmem:[%s1816_s21 + $0x160] ss:$8 sps:$4 sm:$0xff]   ;;  %v1627_v34 = vld [vmem:[%s1816_s21 + $0x84] ss:$8 sps:$4 sm:$0xff]  }
  0x1c   : > { %427 = vmatprep.subr.bf16.mxu0 %v1597_v14  ;;  %661 = vmatprep.subr.bf16.mxu1 %v1599_v15  ;;  %v1629_v35 = vld [vmem:[%s1816_s21 + $0x174] ss:$8 sps:$4 sm:$0xff]   ;;  %v1631_v36 = vld [vmem:[%s1816_s21 + $0x80] ss:$8 sps:$4 sm:$0xff]   ;;  %v1632_v37 = vld [vmem:[%s1816_s21 + $0x170] ss:$8 sps:$4 sm:$0xff]  }
  0x1d   : > { %v1633_v38 = vld [vmem:[%s1816_s21 + $0x94] ss:$8 sps:$4 sm:$0xff]   ;;  %v1635_v39 = vld [vmem:[%s1816_s21 + $0x184] ss:$8 sps:$4 sm:$0xff]   ;;  %v1637_v40 = vld [vmem:[%s1816_s21 + $0x90] ss:$8 sps:$4 sm:$0xff]  }
  0x1e   : > { %v1638_v41 = vld [vmem:[%s1816_s21 + $0x180] ss:$8 sps:$4 sm:$0xff]   ;;  %v1639_v42 = vld [vmem:[%s1816_s21 + $0xa4] ss:$8 sps:$4 sm:$0xff]   ;;  %v1641_v43 = vld [vmem:[%s1816_s21 + $0x194] ss:$8 sps:$4 sm:$0xff]  }
  0x1f   : > { %428 = vmatpush1.bf16.msra.mxu0 %v1601_v16  ;;  %662 = vmatpush1.bf16.msra.mxu1 %v1602_v17  ;;  %v1643_v44 = vld [vmem:[%s1816_s21 + $0xa0] ss:$8 sps:$4 sm:$0xff]   ;;  %v1644_v45 = vld [vmem:[%s1816_s21 + $0x190] ss:$8 sps:$4 sm:$0xff]   ;;  %v1645_v46 = vld [vmem:[%s1816_s21 + $0xb4] ss:$8 sps:$4 sm:$0xff]  }
  0x20   : > { %429 = vmatprep.subr.bf16.mxu0 %v1603_v18  ;;  %663 = vmatprep.subr.bf16.mxu1 %v1605_v19  ;;  %v1647_v47 = vld [vmem:[%s1816_s21 + $0x1a4] ss:$8 sps:$4 sm:$0xff]   ;;  %v1649_v48 = vld [vmem:[%s1816_s21 + $0xb0] ss:$8 sps:$4 sm:$0xff]   ;;  %v1650_v49 = vld [vmem:[%s1816_s21 + $0x1a0] ss:$8 sps:$4 sm:$0xff]  }
  0x21   : > { %v1651_v50 = vld [vmem:[%s1816_s21 + $0xc4] ss:$8 sps:$4 sm:$0xff]   ;;  %v1653_v51 = vld [vmem:[%s1816_s21 + $0x1b4] ss:$8 sps:$4 sm:$0xff]   ;;  %v1655_v52 = vld [vmem:[%s1816_s21 + $0xc0] ss:$8 sps:$4 sm:$0xff]  }
  0x22   : > { %v1656_v53 = vld [vmem:[%s1816_s21 + $0x1b0] ss:$8 sps:$4 sm:$0xff]   ;;  %v1657_v54 = vld [vmem:[%s1816_s21 + $0xd4] ss:$8 sps:$4 sm:$0xff]   ;;  %v1659_v55 = vld [vmem:[%s1816_s21 + $0x1c4] ss:$8 sps:$4 sm:$0xff]  }
  0x23   : > { %430 = vmatpush1.bf16.msra.mxu0 %v1607_v20  ;;  %664 = vmatpush1.bf16.msra.mxu1 %v1608_v21  ;;  %v1661_v56 = vld [vmem:[%s1816_s21 + $0xd0] ss:$8 sps:$4 sm:$0xff]   ;;  %v1662_v57 = vld [vmem:[%s1816_s21 + $0x1c0] ss:$8 sps:$4 sm:$0xff]   ;;  %v1663_v58 = vld [vmem:[%s1816_s21 + $0xe4] ss:$8 sps:$4 sm:$0xff]  }
  0x24   : > { %431 = vmatprep.subr.bf16.mxu0 %v1609_v22  ;;  %665 = vmatprep.subr.bf16.mxu1 %v1611_v23  ;;  %v1665_v59 = vld [vmem:[%s1816_s21 + $0x1d4] ss:$8 sps:$4 sm:$0xff]   ;;  %v1667_v60 = vld [vmem:[%s1816_s21 + $0xe0] ss:$8 sps:$4 sm:$0xff]   ;;  %v1668_v61 = vld [vmem:[%s1816_s21 + $0x1d0] ss:$8 sps:$4 sm:$0xff]  }
  0x25   : > { %v1674_v62 = vld [vmem:[%s1816_s21 + $0x1e4] ss:$8 sps:$4 sm:$0xff]   ;;  %v1677_v63 = vld [vmem:[%s1816_s21 + $0x2d4] ss:$8 sps:$4 sm:$0xff]   ;;  %v1888_v1 = vld [vmem:[%s1811_s18] ss:$8 sps:$4 sm:$0xff]  }
  0x26   : > { %v1672_v2 = vld [vmem:[%s1816_s21 + $0x1e0] ss:$8 sps:$4 sm:$0xff]   ;;  %v1675_v3 = vld [vmem:[%s1816_s21 + $0x2d0] ss:$8 sps:$4 sm:$0xff]   ;;  %v1680_v4 = vld [vmem:[%s1816_s21 + $0x1f4] ss:$8 sps:$4 sm:$0xff]  }
  0x27   : > { %432 = vmatpush1.bf16.msra.mxu0 %v1613_v24  ;;  %666 = vmatpush1.bf16.msra.mxu1 %v1614_v25  ;;  %v1683_v5 = vld [vmem:[%s1816_s21 + $0x2e4] ss:$8 sps:$4 sm:$0xff]   ;;  %v1678_v6 = vld [vmem:[%s1816_s21 + $0x1f0] ss:$8 sps:$4 sm:$0xff]   ;;  %v1681_v7 = vld [vmem:[%s1816_s21 + $0x2e0] ss:$8 sps:$4 sm:$0xff]  }
  0x28   : > { %433 = vmatprep.subr.bf16.mxu0 %v1615_v26  ;;  %667 = vmatprep.subr.bf16.mxu1 %v1617_v27  ;;  %v1686_v8 = vld [vmem:[%s1816_s21 + $0x204] ss:$8 sps:$4 sm:$0xff]   ;;  %v1689_v9 = vld [vmem:[%s1816_s21 + $0x2f4] ss:$8 sps:$4 sm:$0xff]   ;;  %v1684_v10 = vld [vmem:[%s1816_s21 + $0x200] ss:$8 sps:$4 sm:$0xff]  }
  0x29   : > { %v1687_v11 = vld [vmem:[%s1816_s21 + $0x2f0] ss:$8 sps:$4 sm:$0xff]   ;;  %v1692_v12 = vld [vmem:[%s1816_s21 + $0x214] ss:$8 sps:$4 sm:$0xff]   ;;  %v1695_v13 = vld [vmem:[%s1816_s21 + $0x304] ss:$8 sps:$4 sm:$0xff]  }
  0x2a   : > { %v1690_v14 = vld [vmem:[%s1816_s21 + $0x210] ss:$8 sps:$4 sm:$0xff]   ;;  %v1693_v15 = vld [vmem:[%s1816_s21 + $0x300] ss:$8 sps:$4 sm:$0xff]   ;;  %v1698_v16 = vld [vmem:[%s1816_s21 + $0x224] ss:$8 sps:$4 sm:$0xff]  }
  0x2b   : > { %434 = vmatpush1.bf16.msra.mxu0 %v1619_v28  ;;  %668 = vmatpush1.bf16.msra.mxu1 %v1620_v29  ;;  %v1701_v17 = vld [vmem:[%s1816_s21 + $0x314] ss:$8 sps:$4 sm:$0xff]   ;;  %v1696_v19 = vld [vmem:[%s1816_s21 + $0x220] ss:$8 sps:$4 sm:$0xff]   ;;  %v1699_v20 = vld [vmem:[%s1816_s21 + $0x310] ss:$8 sps:$4 sm:$0xff]  }
  0x2c   : > { %435 = vmatprep.subr.bf16.mxu0 %v1621_v30  ;;  %669 = vmatprep.subr.bf16.mxu1 %v1623_v31  ;;  %v1909_v18 = vld [vmem:[%s1811_s18 + $0x14] ss:$8 sps:$4 sm:$0xff]   ;;  %v1918_v21 = vld [vmem:[%s1811_s18 + $0x10] ss:$8 sps:$4 sm:$0xff]   ;;  %v1707_v23 = vld [vmem:[%s1816_s21 + $0x324] ss:$8 sps:$4 sm:$0xff]  }
  0x2d   : > { %v1704_v22 = vld [vmem:[%s1816_s21 + $0x234] ss:$8 sps:$4 sm:$0xff]   ;;  %v1702_v24 = vld [vmem:[%s1816_s21 + $0x230] ss:$8 sps:$4 sm:$0xff]   ;;  %v1705_v25 = vld [vmem:[%s1816_s21 + $0x320] ss:$8 sps:$4 sm:$0xff]  }
  0x2e   : > { %v1710_v26 = vld [vmem:[%s1816_s21 + $0x244] ss:$8 sps:$4 sm:$0xff]   ;;  %v1713_v27 = vld [vmem:[%s1816_s21 + $0x334] ss:$8 sps:$4 sm:$0xff]   ;;  %v1711_v31 = vld [vmem:[%s1816_s21 + $0x330] ss:$8 sps:$4 sm:$0xff]  }
  0x2f   : > { %436 = vmatpush1.bf16.msra.mxu0 %v1625_v32  ;;  %670 = vmatpush1.bf16.msra.mxu1 %v1626_v33  ;;  %v1200_v28 = vld [vmem:[%s205_s24] sm:$0xff]  ;;  %v1202_v29 = vld [vmem:[%s205_s24 + $0x10] sm:$0xff]  ;;  %v1201_v30 = vld [vmem:[%s205_s24 + $0x8] sm:$0xff] }
  0x30   : > { %437 = vmatprep.subr.bf16.mxu0 %v1627_v34  ;;  %671 = vmatprep.subr.bf16.mxu1 %v1629_v35  ;;  %v1203_v32 = vld [vmem:[%s205_s24 + $0x18] sm:$0xff]  ;;  %v1719_v34 = vld [vmem:[%s1816_s21 + $0x344] ss:$8 sps:$4 sm:$0xff]  }
  0x31   : > { %1206 = vperm.xlu0 %1577, %v1200_v28   ;;  %1216 = vperm.xlu1 %1578, %v1202_v29   ;;  %v1716_v33 = vld [vmem:[%s1816_s21 + $0x254] ss:$8 sps:$4 sm:$0xff]   ;;  %v1714_v35 = vld [vmem:[%s1816_s21 + $0x250] ss:$8 sps:$4 sm:$0xff]  }
  0x33   : > { %438 = vmatpush1.bf16.msra.mxu0 %v1631_v36  ;;  %672 = vmatpush1.bf16.msra.mxu1 %v1632_v37  ;;  %v1717_v36 = vld [vmem:[%s1816_s21 + $0x340] ss:$8 sps:$4 sm:$0xff]   ;;  %v1722_v37 = vld [vmem:[%s1816_s21 + $0x264] ss:$8 sps:$4 sm:$0xff]  }
  0x34   : > { %439 = vmatprep.subr.bf16.mxu0 %v1633_v38  ;;  %673 = vmatprep.subr.bf16.mxu1 %v1635_v39  ;;  %v1725_v38 = vld [vmem:[%s1816_s21 + $0x354] ss:$8 sps:$4 sm:$0xff]   ;;  %v1720_v39 = vld [vmem:[%s1816_s21 + $0x260] ss:$8 sps:$4 sm:$0xff]  }
  0x35   : > { %1211 = vperm.xlu0 %1577, %v1201_v30   ;;  %1221 = vperm.xlu1 %1578, %v1203_v32  }
  0x37   : > { %440 = vmatpush1.bf16.msra.mxu0 %v1637_v40  ;;  %674 = vmatpush1.bf16.msra.mxu1 %v1638_v41  ;;  %v1723_v40 = vld [vmem:[%s1816_s21 + $0x350] ss:$8 sps:$4 sm:$0xff]   ;;  %v1728_v41 = vld [vmem:[%s1816_s21 + $0x274] ss:$8 sps:$4 sm:$0xff]  }
  0x38   : > { %441 = vmatprep.subr.bf16.mxu0 %v1639_v42  ;;  %675 = vmatprep.subr.bf16.mxu1 %v1641_v43  ;;  %v1731_v42 = vld [vmem:[%s1816_s21 + $0x364] ss:$8 sps:$4 sm:$0xff]   ;;  %v1726_v43 = vld [vmem:[%s1816_s21 + $0x270] ss:$8 sps:$4 sm:$0xff]  }
  0x3b   : > { %442 = vmatpush1.bf16.msra.mxu0 %v1643_v44  ;;  %676 = vmatpush1.bf16.msra.mxu1 %v1644_v45  ;;  %v1729_v44 = vld [vmem:[%s1816_s21 + $0x360] ss:$8 sps:$4 sm:$0xff]   ;;  %v1734_v45 = vld [vmem:[%s1816_s21 + $0x284] ss:$8 sps:$4 sm:$0xff]  }
  0x3c   : > { %443 = vmatprep.subr.bf16.mxu0 %v1645_v46  ;;  %677 = vmatprep.subr.bf16.mxu1 %v1647_v47  ;;  %v1737_v46 = vld [vmem:[%s1816_s21 + $0x374] ss:$8 sps:$4 sm:$0xff]   ;;  %v1732_v47 = vld [vmem:[%s1816_s21 + $0x280] ss:$8 sps:$4 sm:$0xff]  }
  0x3f   : > { %444 = vmatpush1.bf16.msra.mxu0 %v1649_v48  ;;  %678 = vmatpush1.bf16.msra.mxu1 %v1650_v49  ;;  %v1735_v48 = vld [vmem:[%s1816_s21 + $0x370] ss:$8 sps:$4 sm:$0xff]   ;;  %v1740_v49 = vld [vmem:[%s1816_s21 + $0x294] ss:$8 sps:$4 sm:$0xff]  }
  0x40   : > { %445 = vmatprep.subr.bf16.mxu0 %v1651_v50  ;;  %679 = vmatprep.subr.bf16.mxu1 %v1653_v51  ;;  %v1743_v50 = vld [vmem:[%s1816_s21 + $0x384] ss:$8 sps:$4 sm:$0xff]   ;;  %v1738_v51 = vld [vmem:[%s1816_s21 + $0x290] ss:$8 sps:$4 sm:$0xff]  }
  0x43   : > { %446 = vmatpush1.bf16.msra.mxu0 %v1655_v52  ;;  %680 = vmatpush1.bf16.msra.mxu1 %v1656_v53  ;;  %v1741_v52 = vld [vmem:[%s1816_s21 + $0x380] ss:$8 sps:$4 sm:$0xff]   ;;  %v1748_v53 = vld [vmem:[%s1816_s21 + $0x2a4] ss:$8 sps:$4 sm:$0xff]  }
  0x44   : > { %447 = vmatprep.subr.bf16.mxu0 %v1657_v54  ;;  %681 = vmatprep.subr.bf16.mxu1 %v1659_v55  ;;  %v1751_v54 = vld [vmem:[%s1816_s21 + $0x394] ss:$8 sps:$4 sm:$0xff]   ;;  %v1746_v55 = vld [vmem:[%s1816_s21 + $0x2a0] ss:$8 sps:$4 sm:$0xff]  }
  0x47   : > { %448 = vmatpush1.bf16.msra.mxu0 %v1661_v56  ;;  %682 = vmatpush1.bf16.msra.mxu1 %v1662_v57  ;;  %v1749_v56 = vld [vmem:[%s1816_s21 + $0x390] ss:$8 sps:$4 sm:$0xff]   ;;  %v1755_v57 = vld [vmem:[%s1816_s21 + $0x2b4] ss:$8 sps:$4 sm:$0xff]  }
  0x48   : > { %449 = vmatprep.subr.bf16.mxu0 %v1663_v58  ;;  %683 = vmatprep.subr.bf16.mxu1 %v1665_v59  ;;  %v1758_v58 = vld [vmem:[%s1816_s21 + $0x3a4] ss:$8 sps:$4 sm:$0xff]   ;;  %v1753_v59 = vld [vmem:[%s1816_s21 + $0x2b0] ss:$8 sps:$4 sm:$0xff]  }
  0x4b   : > { %450 = vmatpush1.bf16.msra.mxu0 %v1667_v60  ;;  %684 = vmatpush1.bf16.msra.mxu1 %v1668_v61  ;;  %v1756_v60 = vld [vmem:[%s1816_s21 + $0x3a0] ss:$8 sps:$4 sm:$0xff]   ;;  %v1761_v61 = vld [vmem:[%s1816_s21 + $0x2c4] ss:$8 sps:$4 sm:$0xff]  }
  0x4c   : > { %889 = vmatprep.subr.bf16.mxu0 %v1674_v62  ;;  %1123 = vmatprep.subr.bf16.mxu1 %v1677_v63  ;;  %v1764_v62 = vld [vmem:[%s1816_s21 + $0x3b4] ss:$8 sps:$4 sm:$0xff]   ;;  %v1759_v63 = vld [vmem:[%s1816_s21 + $0x2c0] ss:$8 sps:$4 sm:$0xff]  }
  0x4e   : > { %454 = vmatmul.mubr.bf16.vlgmr.msra.gmra.mrb[0].mxu0 %v1888_v1  ;;  %688 = vmatmul.mubr.bf16.vlgmr.msra.gmra.mrb[0].mxu1 %v1888_v1 }
  0x4f   : > { %890 = vmatpush1.bf16.msra.mxu0 %v1672_v2  ;;  %1124 = vmatpush1.bf16.msra.mxu1 %v1675_v3  ;;  %v1762_v2 = vld [vmem:[%s1816_s21 + $0x3b0] ss:$8 sps:$4 sm:$0xff]  }
  0x50   : > { %891 = vmatprep.subr.bf16.mxu0 %v1680_v4  ;;  %1125 = vmatprep.subr.bf16.mxu1 %v1683_v5 }
  0x51   : > { %1375 = vmatprep.mubr.msk.bf16.mxu0 %vm414_vm0, %v1909_v18  ;;  %1437 = vmatprep.mubr.msk.bf16.mxu1 %vm414_vm0, %v1909_v18 }
  0x53   : > { %892 = vmatpush1.bf16.msra.mxu0 %v1678_v6  ;;  %1126 = vmatpush1.bf16.msra.mxu1 %v1681_v7 }
  0x54   : > { %893 = vmatprep.subr.bf16.mxu0 %v1686_v8  ;;  %1127 = vmatprep.subr.bf16.mxu1 %v1689_v9 }
  0x56   : > { %464 = vmatmul.mubr.bf16.gmra.mrb[4].mxu0 %v1918_v21  ;;  %698 = vmatmul.mubr.bf16.gmra.mrb[4].mxu1 %v1918_v21 }
  0x57   : > { %894 = vmatpush1.bf16.msra.mxu0 %v1684_v10  ;;  %1128 = vmatpush1.bf16.msra.mxu1 %v1687_v11 }
  0x58   : > { %895 = vmatprep.subr.bf16.mxu0 %v1692_v12  ;;  %1129 = vmatprep.subr.bf16.mxu1 %v1695_v13 }
  0x59   : > { %1498 = vmatprep.mubr.msk.bf16.mxu0 %vm414_vm0, %v1819_v0  ;;  %1560 = vmatprep.mubr.msk.bf16.mxu1 %vm414_vm0, %v1819_v0  ;;  %v1708_v0 = vld [vmem:[%s1816_s21 + $0x240] ss:$8 sps:$4 sm:$0xff]  }
  0x5b   : > { %896 = vmatpush1.bf16.msra.mxu0 %v1690_v14  ;;  %1130 = vmatpush1.bf16.msra.mxu1 %v1693_v15 }
  0x5c   : > { %897 = vmatprep.subr.bf16.mxu0 %v1698_v16  ;;  %1131 = vmatprep.subr.bf16.mxu1 %v1701_v17 }
  0x5f   : > { %898 = vmatpush1.bf16.msra.mxu0 %v1696_v19  ;;  %1132 = vmatpush1.bf16.msra.mxu1 %v1699_v20 }
  0x60   : > { %899 = vmatprep.subr.bf16.mxu0 %v1704_v22  ;;  %1133 = vmatprep.subr.bf16.mxu1 %v1707_v23 }
  0x63   : > { %900 = vmatpush1.bf16.msra.mxu0 %v1702_v24  ;;  %1134 = vmatpush1.bf16.msra.mxu1 %v1705_v25 }
  0x64   : > { %901 = vmatprep.subr.bf16.mxu0 %v1710_v26  ;;  %1135 = vmatprep.subr.bf16.mxu1 %v1713_v27 }
  0x67   : > { %902 = vmatpush1.bf16.msra.mxu0 %v1708_v0  ;;  %1136 = vmatpush1.bf16.msra.mxu1 %v1711_v31 }
  0x68   : > { %903 = vmatprep.subr.bf16.mxu0 %v1716_v33  ;;  %1137 = vmatprep.subr.bf16.mxu1 %v1719_v34 }
  0x6b   : > { %904 = vmatpush1.bf16.msra.mxu0 %v1714_v35  ;;  %1138 = vmatpush1.bf16.msra.mxu1 %v1717_v36 }
  0x6c   : > { %905 = vmatprep.subr.bf16.mxu0 %v1722_v37  ;;  %1139 = vmatprep.subr.bf16.mxu1 %v1725_v38 }
  0x6f   : > { %906 = vmatpush1.bf16.msra.mxu0 %v1720_v39  ;;  %1140 = vmatpush1.bf16.msra.mxu1 %v1723_v40 }
  0x70   : > { %907 = vmatprep.subr.bf16.mxu0 %v1728_v41  ;;  %1141 = vmatprep.subr.bf16.mxu1 %v1731_v42 }
  0x73   : > { %908 = vmatpush1.bf16.msra.mxu0 %v1726_v43  ;;  %1142 = vmatpush1.bf16.msra.mxu1 %v1729_v44 }
  0x74   : > { %909 = vmatprep.subr.bf16.mxu0 %v1734_v45  ;;  %1143 = vmatprep.subr.bf16.mxu1 %v1737_v46 }
  0x77   : > { %910 = vmatpush1.bf16.msra.mxu0 %v1732_v47  ;;  %1144 = vmatpush1.bf16.msra.mxu1 %v1735_v48 }
  0x78   : > { %911 = vmatprep.subr.bf16.mxu0 %v1740_v49  ;;  %1145 = vmatprep.subr.bf16.mxu1 %v1743_v50 }
  0x7b   : > { %912 = vmatpush1.bf16.msra.mxu0 %v1738_v51  ;;  %1146 = vmatpush1.bf16.msra.mxu1 %v1741_v52 }
  0x7c   : > { %913 = vmatprep.subr.bf16.mxu0 %v1748_v53  ;;  %1147 = vmatprep.subr.bf16.mxu1 %v1751_v54 }
  0x7f   : > { %914 = vmatpush1.bf16.msra.mxu0 %v1746_v55  ;;  %1148 = vmatpush1.bf16.msra.mxu1 %v1749_v56 }
  0x80   : > { %915 = vmatprep.subr.bf16.mxu0 %v1755_v57  ;;  %1149 = vmatprep.subr.bf16.mxu1 %v1758_v58 }
  0x83   : > { %916 = vmatpush1.bf16.msra.mxu0 %v1753_v59  ;;  %1150 = vmatpush1.bf16.msra.mxu1 %v1756_v60 }
  0x84   : > { %917 = vmatprep.subr.bf16.mxu0 %v1761_v61  ;;  %1151 = vmatprep.subr.bf16.mxu1 %v1764_v62 }
  0x87   : > { %918 = vmatpush1.bf16.msra.mxu0 %v1759_v63  ;;  %1152 = vmatpush1.bf16.msra.mxu1 %v1762_v2 }
  0x8a   : > { %922 = vmatmul.mubr.bf16.vlgmr.msra.gmra.mrb[8].mxu0 %v1888_v1  ;;  %1156 = vmatmul.mubr.bf16.vlgmr.msra.gmra.mrb[8].mxu1 %v1888_v1 }
  0x8b   : > { %1499 = vmatprep.mubr.msk.bf16.mxu0 %vm414_vm0, %v1909_v18  ;;  %1561 = vmatprep.mubr.msk.bf16.mxu1 %vm414_vm0, %v1909_v18 }
  0x92   : > { %932 = vmatmul.mubr.bf16.gmra.mrb[12].mxu0 %v1918_v21  ;;  %1166 = vmatmul.mubr.bf16.gmra.mrb[12].mxu1 %v1918_v21 }
  0xb0   : > { %v1207_v26 = vpop.permute.xlu0 %1206  ;;  %v1217_v47 = vpop.permute.xlu1 %1216 }
  0xb4   : > { %v1212_v40 = vpop.permute.xlu0 %1211 }
 0x121   : > { %v455_v3 = vpop.f32.mrb[0].mxu0  ;;  %v689_v4 = vpop.f32.mrb[0].mxu1 }
 0x122   : > { %v1176_v5 = vmax.f32 %v455_v3, %v689_v4  ;;  %v457_v6 = vpop.f32.mrb[1].mxu0  ;;  %v691_v7 = vpop.f32.mrb[1].mxu1 }
 0x123   : > { %v1177_v8 = vmax.f32 %v457_v6, %v691_v7  ;;  %v459_v9 = vpop.f32.mrb[2].mxu0  ;;  %v693_v10 = vpop.f32.mrb[2].mxu1 }
 0x124   : > { %v1178_v11 = vmax.f32 %v459_v9, %v693_v10  ;;  %v461_v1 = vpop.f32.mrb[3].mxu0  ;;  %v695_v12 = vpop.f32.mrb[3].mxu1 }
 0x125   : > { %v1179_v13 = vmax.f32 %v461_v1, %v695_v12  ;;  %v1222_v7 = vpop.permute.xlu1 %1221 }
 0x129   : > { %v465_v14 = vpop.f32.mrb[4].mxu0  ;;  %v699_v15 = vpop.f32.mrb[4].mxu1 }
 0x12a   : > { %v1180_v16 = vmax.f32 %v465_v14, %v699_v15  ;;  %v467_v17 = vpop.f32.mrb[5].mxu0  ;;  %v701_v18 = vpop.f32.mrb[5].mxu1 }
 0x12b   : > { %v1181_v19 = vmax.f32 %v467_v17, %v701_v18  ;;  %v469_v20 = vpop.f32.mrb[6].mxu0  ;;  %v703_v21 = vpop.f32.mrb[6].mxu1 }
 0x12c   : > { %v1182_v22 = vmax.f32 %v469_v20, %v703_v21  ;;  %v471_v23 = vpop.f32.mrb[7].mxu0  ;;  %v705_v24 = vpop.f32.mrb[7].mxu1 }
 0x12d   : > { %v1183_v25 = vmax.f32 %v471_v23, %v705_v24 }
 0x15d   : > { %v923_v27 = vpop.f32.mrb[8].mxu0  ;;  %v1157_v28 = vpop.f32.mrb[8].mxu1 }
 0x15e   : > { %v1184_v29 = vmax.f32 %v923_v27, %v1157_v28  ;;  %v925_v30 = vpop.f32.mrb[9].mxu0  ;;  %v1159_v0 = vpop.f32.mrb[9].mxu1 }
 0x15f   : > { %v1185_v31 = vmax.f32 %v925_v30, %v1159_v0  ;;  %v927_v32 = vpop.f32.mrb[10].mxu0  ;;  %v1161_v33 = vpop.f32.mrb[10].mxu1 }
 0x160   : > { %v1192_v34 = vmax.f32 %v1176_v5, %v1184_v29  ;;  %v1186_v35 = vmax.f32 %v927_v32, %v1161_v33  ;;  %v929_v36 = vpop.f32.mrb[11].mxu0  ;;  %v1163_v37 = vpop.f32.mrb[11].mxu1 }
 0x161   : > { %v1193_v38 = vmax.f32 %v1177_v8, %v1185_v31  ;;  %v1187_v39 = vmax.f32 %v929_v36, %v1163_v37 }
 0x162   : > { %v1224_v41 = vadd.f32 %v1207_v26, %v1192_v34  ;;  %v1194_v42 = vmax.f32 %v1178_v11, %v1186_v35 }
 0x163   : > { %v1225_v43 = vadd.f32 %v1207_v26, %v1193_v38  ;;  %v1195_v44 = vmax.f32 %v1179_v13, %v1187_v39 }
 0x164   : > { %v1232_v45 = vmax.f32 %v1224_v41, 0.0  ;;  %v1226_v46 = vadd.f32 %v1212_v40, %v1194_v42 }
 0x165   : > { %v1233_v48 = vmax.f32 %v1225_v43, 0.0  ;;  %v1227_v49 = vadd.f32 %v1212_v40, %v1195_v44  ;;  %v933_v50 = vpop.f32.mrb[12].mxu0  ;;  %v1167_v51 = vpop.f32.mrb[12].mxu1 }
 0x166   : > { %1240 = vst [vmem:[%s1983_s28] sm:$0xff] %v1232_v45  ;;  %v1234_v52 = vmax.f32 %v1226_v46, 0.0  ;;  %v1188_v53 = vmax.f32 %v933_v50, %v1167_v51  ;;  %v935_v54 = vpop.f32.mrb[13].mxu0  ;;  %v1169_v55 = vpop.f32.mrb[13].mxu1 }
 0x167   : > { %1242 = vst.msk [vmem:[%s1983_s28 + $0x8] sm:$0xff] %vm1241_vm1, %v1233_v48  ;;  %v1235_v56 = vmax.f32 %v1227_v49, 0.0  ;;  %v1189_v57 = vmax.f32 %v935_v54, %v1169_v55  ;;  %v937_v58 = vpop.f32.mrb[14].mxu0  ;;  %v1171_v59 = vpop.f32.mrb[14].mxu1 }
 0x168   : > { %1243 = vst [vmem:[%s1983_s28 + $0x10] sm:$0xff] %v1234_v52  ;;  %v1196_v60 = vmax.f32 %v1180_v16, %v1188_v53  ;;  %v1190_v61 = vmax.f32 %v937_v58, %v1171_v59  ;;  %v939_v62 = vpop.f32.mrb[15].mxu0  ;;  %v1173_v63 = vpop.f32.mrb[15].mxu1 }
 0x169   : > { %1244 = vst.msk [vmem:[%s1983_s28 + $0x18] sm:$0xff] %vm1241_vm1, %v1235_v56  ;;  %v1197_v2 = vmax.f32 %v1181_v19, %v1189_v57  ;;  %v1191_v3 = vmax.f32 %v939_v62, %v1173_v63 }
 0x16a   : > { %v1228_v4 = vadd.f32 %v1217_v47, %v1196_v60  ;;  %v1198_v5 = vmax.f32 %v1182_v22, %v1190_v61 }
 0x16b   : > { %v1229_v6 = vadd.f32 %v1217_v47, %v1197_v2  ;;  %v1199_v8 = vmax.f32 %v1183_v25, %v1191_v3 }
 0x16c   : > { %v1236_v9 = vmax.f32 %v1228_v4, 0.0  ;;  %v1230_v10 = vadd.f32 %v1222_v7, %v1198_v5 }
 0x16d   : > { %v1237_v11 = vmax.f32 %v1229_v6, 0.0  ;;  %v1231_v1 = vadd.f32 %v1222_v7, %v1199_v8 }
 0x16e   : > { %1245 = vst [vmem:[%s1983_s28 + $0x20] sm:$0xff] %v1236_v9  ;;  %v1238_v12 = vmax.f32 %v1230_v10, 0.0 }
 0x16f   : > { %1246 = vst.msk [vmem:[%s1983_s28 + $0x28] sm:$0xff] %vm1241_vm1, %v1237_v11  ;;  %v1239_v13 = vmax.f32 %v1231_v1, 0.0 }
 0x170   : > { %1247 = vst [vmem:[%s1983_s28 + $0x30] sm:$0xff] %v1238_v12 }
 0x171   : > { %1248 = vst.msk [vmem:[%s1983_s28 + $0x38] sm:$0xff] %vm1241_vm1, %v1239_v13 }
 0x172 PF: > { %s13_s12 = sadd.s32 1, %s1771_s12  }
 0x173   : > { %p10_p4 = scmp.ge.s32.totalorder %s13_s12, 4  }
 0x175   :  { %12 = sbr.rel (!%p10_p4) target bundleno = 1 (0x1), region = 71 }

// kernel: image_dual_net_single_v1_forward.7
= control target key start
LH: loop header
LB: loop body
LE: loop exit
PB: predicated region body
PF: predicated region fallthrough
CT: control target
= control target key end

     0   :  { %s1612_s12 = smov 0   ;;  %s1889_s0 = inlined_call_operand.vmem [shape: bf16[2,2,480,64], index: 0, kind: input, shape index: {}]   ;;  %s1890_s1 = inlined_call_operand.vmem [shape: bf16[2,64,480], index: 1, kind: input, shape index: {}]   ;;  %s1891_s2 = inlined_call_operand.vmem [shape: f32[2,64,1], index: 2, kind: input, shape index: {}]   ;;  %s1892_s3 = inlined_call_operand.vmem [shape: f32[2,64,64], index: 3, kind: output, shape index: {}]  }
   0x1 LB: > { %s1218_s13 = sadd.s32 4294967295, %s1589_s12   ;;  %p1222_p0 = scmp.ge.s32.totalorder %s1589_s12, 1  ;;  %s1589_s12 = sphi %s1612_s12, %s13_s12  }
   0x2   : > { %p157_p1 = scmp.lt.s32.totalorder %s1589_s12, 3 }
   0x4   : > { %p158_p2 = pnand %p1222_p0, %p157_p1 }
   0x5   : > { %p191_p3 = scmp.lt.s32.totalorder (!%p158_p2), %s1218_s13, 1  ;;  %v1591_v0 = vmov (!%p158_p2), 0   ;;  %vm544_vm0 = vcmask (!%p158_p2), 785408   ;;  %vm1130_vm1 = vcmask (!%p158_p2), 523264  }
   0x6   : > { %161 = sbr.rel (%p158_p2) target bundleno = 369 (0x171), region = 32  ;;  %622 = vmatprep.subr.bf16.mxu1 (!%p158_p2), %v1591_v0  ;;  %1498 = vset.pattern.permute.xlu1 (!%p158_p2), %v1591_v0 }
   0x7   : > { %1497 = vset.pattern.permute.xlu0 (!%p158_p2), %v1591_v0 }
   0xd   : > { %s1894_s13 = smov (!%p191_p3, %s1218_s13), 1 }
   0xe   : > { %s1487_s14 = smul.u32 480, %s1894_s13  ;;  %s1376_s15 = sshll.u32 %s1894_s13, 7 }
   0xf   : > { %s1630_s18 = scalar_lea.vmem %s1890_s1, %s1376_s15  ;;  %s1377_s22 = sshll.u32 %s1894_s13, 6 }
  0x10   : > { %s1635_s21 = scalar_lea.vmem %s1889_s0, %s1487_s14  ;;  %v1665_v22 = vld [vmem:[%s1630_s18 + $0x4] ss:$16 sps:$4 sm:$0xff]   ;;  %v1674_v27 = vld [vmem:[%s1630_s18] ss:$16 sps:$4 sm:$0xff]   ;;  %v1707_v44 = vld [vmem:[%s1630_s18 + $0xc] ss:$16 sps:$4 sm:$0xff]   ;;  %s1763_s25 = scalar_lea.vmem %s1891_s2, %s1377_s22 }
  0x11   : > { %v1499_v1 = vld [vmem:[%s1635_s21 + $0x40] sm:$0xff]   ;;  %v1502_v4 = vld [vmem:[%s1635_s21 + $0x48] sm:$0xff]   ;;  %v1505_v7 = vld [vmem:[%s1635_s21 + $0x50] sm:$0xff]   ;;  %589 = vmatprep.mubr.bf16.mxu0 %v1665_v22  ;;  %1276 = vmatprep.mubr.msk.bf16.mxu1 %vm544_vm0, %v1707_v44  ;;  %s1861_s28 = scalar_lea.vmem %s1892_s3, %s1377_s22 }
  0x12   : > { %v1500_v2 = vld [vmem:[%s1635_s21 + $0x80] sm:$0xff]   ;;  %1379 = vmatprep.subr.bf16.mxu0 %v1499_v1  ;;  %v1503_v5 = vld [vmem:[%s1635_s21 + $0x88] sm:$0xff]   ;;  %v1506_v8 = vld [vmem:[%s1635_s21 + $0x90] sm:$0xff]  }
  0x13   : > { %v1501_v3 = vld [vmem:[%s1635_s21] sm:$0xff]   ;;  %623 = vmatpush1.bf16.msra.mxu1 %v1500_v2  ;;  %v1504_v6 = vld [vmem:[%s1635_s21 + $0x8] sm:$0xff]   ;;  %v1507_v9 = vld [vmem:[%s1635_s21 + $0x10] sm:$0xff]  }
  0x14   : > { %1380 = vmatpush3.bf16.msra.mxu0 %v1501_v3  ;;  %624 = vmatprep.subr.bf16.mxu1 %v1591_v0  ;;  %v1508_v10 = vld [vmem:[%s1635_s21 + $0x58] sm:$0xff]   ;;  %v1511_v13 = vld [vmem:[%s1635_s21 + $0x60] sm:$0xff]   ;;  %v1514_v16 = vld [vmem:[%s1635_s21 + $0x68] sm:$0xff]  }
  0x15   : > { %1381 = vmatprep.subr.bf16.mxu0 %v1502_v4  ;;  %v1509_v11 = vld [vmem:[%s1635_s21 + $0x98] sm:$0xff]   ;;  %v1512_v14 = vld [vmem:[%s1635_s21 + $0xa0] sm:$0xff]   ;;  %v1515_v17 = vld [vmem:[%s1635_s21 + $0xa8] sm:$0xff]  }
  0x16   : > { %v1510_v12 = vld [vmem:[%s1635_s21 + $0x18] sm:$0xff]   ;;  %v1513_v15 = vld [vmem:[%s1635_s21 + $0x20] sm:$0xff]   ;;  %v1516_v18 = vld [vmem:[%s1635_s21 + $0x28] sm:$0xff]  }
  0x17   : > { %625 = vmatpush1.bf16.msra.mxu1 %v1503_v5  ;;  %v1517_v19 = vld [vmem:[%s1635_s21 + $0x70] sm:$0xff]   ;;  %v1520_v23 = vld [vmem:[%s1635_s21 + $0x78] sm:$0xff]   ;;  %v1526_v28 = vld [vmem:[%s1635_s21 + $0xc0] sm:$0xff]  }
  0x18   : > { %1382 = vmatpush3.bf16.msra.mxu0 %v1504_v6  ;;  %626 = vmatprep.subr.bf16.mxu1 %v1591_v0  ;;  %v1518_v20 = vld [vmem:[%s1635_s21 + $0xb0] sm:$0xff]   ;;  %v1521_v24 = vld [vmem:[%s1635_s21 + $0xb8] sm:$0xff]   ;;  %v1529_v32 = vld [vmem:[%s1635_s21 + $0xc8] sm:$0xff]  }
  0x19   : > { %1383 = vmatprep.subr.bf16.mxu0 %v1505_v7  ;;  %v1519_v21 = vld [vmem:[%s1635_s21 + $0x30] sm:$0xff]   ;;  %v1522_v25 = vld [vmem:[%s1635_s21 + $0x38] sm:$0xff]   ;;  %v1535_v34 = vld [vmem:[%s1635_s21 + $0x140] sm:$0xff]  }
  0x1a   : > { %v1527_v26 = vld [vmem:[%s1635_s21 + $0x130] sm:$0xff]   ;;  %v1530_v30 = vld [vmem:[%s1635_s21 + $0x138] sm:$0xff]   ;;  %v1537_v37 = vld [vmem:[%s1635_s21 + $0x100] sm:$0xff]  }
  0x1b   : > { %627 = vmatpush1.bf16.msra.mxu1 %v1506_v8  ;;  %v1528_v29 = vld [vmem:[%s1635_s21 + $0xf0] sm:$0xff]   ;;  %v1531_v33 = vld [vmem:[%s1635_s21 + $0xf8] sm:$0xff]   ;;  %v1539_v38 = vld [vmem:[%s1635_s21 + $0x148] sm:$0xff]  }
  0x1c   : > { %1384 = vmatpush3.bf16.msra.mxu0 %v1507_v9  ;;  %628 = vmatprep.subr.bf16.mxu1 %v1591_v0  ;;  %v1681_v31 = vld [vmem:[%s1630_s18 + $0x24] ss:$16 sps:$4 sm:$0xff]   ;;  %v1691_v36 = vld [vmem:[%s1630_s18 + $0x20] ss:$16 sps:$4 sm:$0xff]   ;;  %v1538_v40 = vld [vmem:[%s1635_s21 + $0xd8] sm:$0xff]  }
  0x1d   : > { %1385 = vmatprep.subr.bf16.mxu0 %v1508_v10  ;;  %v1534_v35 = vld [vmem:[%s1635_s21 + $0xd0] sm:$0xff]   ;;  %v1540_v41 = vld [vmem:[%s1635_s21 + $0x108] sm:$0xff]   ;;  %v1543_v42 = vld [vmem:[%s1635_s21 + $0xe0] sm:$0xff]  }
  0x1e   : > { %v1697_v39 = vld [vmem:[%s1630_s18 + $0x44] ss:$16 sps:$4 sm:$0xff]   ;;  %v1710_v45 = vld [vmem:[%s1630_s18 + $0x40] ss:$16 sps:$4 sm:$0xff]   ;;  %v1548_v47 = vld [vmem:[%s1635_s21 + $0x158] sm:$0xff]  }
  0x1f   : > { %629 = vmatpush1.bf16.msra.mxu1 %v1509_v11  ;;  %v1544_v43 = vld [vmem:[%s1635_s21 + $0x150] sm:$0xff]   ;;  %v1547_v49 = vld [vmem:[%s1635_s21 + $0xe8] sm:$0xff]   ;;  %v1549_v50 = vld [vmem:[%s1635_s21 + $0x118] sm:$0xff]  }
  0x20   : > { %1386 = vmatpush3.bf16.msra.mxu0 %v1510_v12  ;;  %630 = vmatprep.subr.bf16.mxu1 %v1591_v0  ;;  %v1546_v46 = vld [vmem:[%s1635_s21 + $0x110] sm:$0xff]   ;;  %v1725_v51 = vld [vmem:[%s1630_s18 + $0x8] ss:$16 sps:$4 sm:$0xff]   ;;  %v1555_v52 = vld [vmem:[%s1635_s21 + $0x160] sm:$0xff]  }
  0x21   : > { %1387 = vmatprep.subr.bf16.mxu0 %v1511_v13  ;;  %v1718_v48 = vld [vmem:[%s1630_s18 + $0x64] ss:$16 sps:$4 sm:$0xff]   ;;  %v1731_v54 = vld [vmem:[%s1630_s18 + $0x60] ss:$16 sps:$4 sm:$0xff]   ;;  %v1559_v56 = vld [vmem:[%s1635_s21 + $0x168] sm:$0xff]  }
  0x22   : > { %v1556_v53 = vld [vmem:[%s1635_s21 + $0x170] sm:$0xff]   ;;  %v1558_v55 = vld [vmem:[%s1635_s21 + $0x120] sm:$0xff]   ;;  %v1737_v57 = vld [vmem:[%s1630_s18 + $0x2c] ss:$16 sps:$4 sm:$0xff]  }
  0x23   : > { %631 = vmatpush1.bf16.msra.mxu1 %v1512_v14  ;;  %v1560_v58 = vld [vmem:[%s1635_s21 + $0x178] sm:$0xff]   ;;  %v1561_v59 = vld [vmem:[%s1635_s21 + $0x128] sm:$0xff]   ;;  %v1565_v61 = vld [vmem:[%s1635_s21 + $0x180] sm:$0xff]  }
  0x24   : > { %1388 = vmatpush3.bf16.msra.mxu0 %v1513_v15  ;;  %632 = vmatprep.subr.bf16.mxu1 %v1591_v0  ;;  %v1747_v60 = vld [vmem:[%s1630_s18 + $0x28] ss:$16 sps:$4 sm:$0xff]   ;;  %v1755_v62 = vld [vmem:[%s1630_s18 + $0x4c] ss:$16 sps:$4 sm:$0xff]   ;;  %v1068_v1 = vld [vmem:[%s1763_s25 + $0x10] sm:$0xff] }
  0x25   : > { %1389 = vmatprep.subr.bf16.mxu0 %v1514_v16  ;;  %v1566_v63 = vld [vmem:[%s1635_s21 + $0x188] sm:$0xff]   ;;  %1086 = vperm.xlu1 %1498, %v1068_v1   ;;  %v1066_v3 = vld [vmem:[%s1763_s25] sm:$0xff]  ;;  %v1570_v4 = vld [vmem:[%s1635_s21 + $0x190] sm:$0xff]  }
  0x26   : > { %v1773_v2 = vld [vmem:[%s1630_s18 + $0x48] ss:$16 sps:$4 sm:$0xff]   ;;  %v1779_v5 = vld [vmem:[%s1630_s18 + $0x6c] ss:$16 sps:$4 sm:$0xff]   ;;  %1076 = vperm.xlu0 %1497, %v1066_v3   ;;  %v1575_v11 = vld [vmem:[%s1635_s21 + $0x1a0] sm:$0xff]  }
  0x27   : > { %633 = vmatpush1.bf16.msra.mxu1 %v1515_v17  ;;  %v1069_v6 = vld [vmem:[%s1763_s25 + $0x18] sm:$0xff]  ;;  %v1067_v8 = vld [vmem:[%s1763_s25 + $0x8] sm:$0xff]  ;;  %v1070_v12 = vld [vmem:[%s1763_s25 + $0x20] sm:$0xff] }
  0x28   : > { %1390 = vmatpush3.bf16.msra.mxu0 %v1516_v18  ;;  %634 = vmatprep.subr.bf16.mxu1 %v1591_v0  ;;  %v1571_v7 = vld [vmem:[%s1635_s21 + $0x198] sm:$0xff]   ;;  %v1071_v9 = vld [vmem:[%s1763_s25 + $0x28] sm:$0xff]  ;;  %v1072_v15 = vld [vmem:[%s1763_s25 + $0x30] sm:$0xff] }
  0x29   : > { %1391 = vmatprep.subr.bf16.mxu0 %v1517_v19  ;;  %1091 = vperm.xlu1 %1498, %v1069_v6   ;;  %v1794_v10 = vld [vmem:[%s1630_s18 + $0x68] ss:$16 sps:$4 sm:$0xff]   ;;  %v1577_v16 = vld [vmem:[%s1635_s21 + $0x1b0] sm:$0xff]   ;;  %v1579_v18 = vld [vmem:[%s1635_s21 + $0x1c0] sm:$0xff]  }
  0x2a   : > { %1081 = vperm.xlu0 %1497, %v1067_v8   ;;  %v1576_v13 = vld [vmem:[%s1635_s21 + $0x1a8] sm:$0xff]   ;;  %v1073_v14 = vld [vmem:[%s1763_s25 + $0x38] sm:$0xff] }
  0x2b   : > { %635 = vmatpush1.bf16.msra.mxu1 %v1518_v20  ;;  %v1578_v17 = vld [vmem:[%s1635_s21 + $0x1b8] sm:$0xff]   ;;  %v1580_v19 = vld [vmem:[%s1635_s21 + $0x1c8] sm:$0xff]   ;;  %v1581_v20 = vld [vmem:[%s1635_s21 + $0x1d0] sm:$0xff]  }
  0x2c   : > { %1392 = vmatpush3.bf16.msra.mxu0 %v1519_v21  ;;  %636 = vmatprep.subr.bf16.mxu1 %v1591_v0  ;;  %v1582_v21 = vld [vmem:[%s1635_s21 + $0x1d8] sm:$0xff]  }
  0x2d   : > { %1393 = vmatprep.subr.bf16.mxu0 %v1520_v23  ;;  %1101 = vperm.xlu1 %1498, %v1071_v9  }
  0x2e   : > { %1096 = vperm.xlu0 %1497, %v1070_v12  }
  0x2f   : > { %637 = vmatpush1.bf16.msra.mxu1 %v1521_v24 }
  0x30   : > { %1394 = vmatpush3.bf16.msra.mxu0 %v1522_v25  ;;  %638 = vmatprep.subr.bf16.mxu1 %v1591_v0 }
  0x31   : > { %1419 = vmatprep.subr.bf16.mxu0 %v1527_v26  ;;  %1111 = vperm.xlu1 %1498, %v1073_v14  }
  0x32   : > { %1106 = vperm.xlu0 %1497, %v1072_v15  }
  0x33   : > { %639 = vmatpush1.bf16.msra.mxu1 %v1526_v28  ;;  %590 = vmatmul.mubr.bf16.vlgmr.msra.gmra.mrb[0].mxu0 %v1674_v27 }
  0x34   : > { %1420 = vmatpush3.bf16.msra.mxu0 %v1528_v29  ;;  %640 = vmatprep.subr.bf16.mxu1 %v1591_v0 }
  0x35   : > { %1421 = vmatprep.subr.bf16.mxu0 %v1530_v30  ;;  %597 = vmatprep.mubr.bf16.mxu0 %v1681_v31 }
  0x37   : > { %641 = vmatpush1.bf16.msra.mxu1 %v1529_v32 }
  0x38   : > { %1422 = vmatpush3.bf16.msra.mxu0 %v1531_v33  ;;  %642 = vmatprep.subr.bf16.mxu1 %v1591_v0 }
  0x39   : > { %1423 = vmatprep.subr.bf16.mxu0 %v1535_v34 }
  0x3b   : > { %643 = vmatpush1.bf16.msra.mxu1 %v1534_v35  ;;  %598 = vmatmul.mubr.bf16.gmra.mrb[4].mxu0 %v1691_v36 }
  0x3c   : > { %1424 = vmatpush3.bf16.msra.mxu0 %v1537_v37  ;;  %644 = vmatprep.subr.bf16.mxu1 %v1591_v0 }
  0x3d   : > { %1425 = vmatprep.subr.bf16.mxu0 %v1539_v38  ;;  %605 = vmatprep.mubr.bf16.mxu0 %v1697_v39 }
  0x3f   : > { %645 = vmatpush1.bf16.msra.mxu1 %v1538_v40 }
  0x40   : > { %1426 = vmatpush3.bf16.msra.mxu0 %v1540_v41  ;;  %646 = vmatprep.subr.bf16.mxu1 %v1591_v0 }
  0x41   : > { %1427 = vmatprep.subr.bf16.mxu0 %v1544_v43 }
  0x43   : > { %647 = vmatpush1.bf16.msra.mxu1 %v1543_v42  ;;  %606 = vmatmul.mubr.bf16.gmra.mrb[8].mxu0 %v1710_v45 }
  0x44   : > { %1428 = vmatpush3.bf16.msra.mxu0 %v1546_v46  ;;  %648 = vmatprep.subr.bf16.mxu1 %v1591_v0 }
  0x45   : > { %1429 = vmatprep.subr.bf16.mxu0 %v1548_v47  ;;  %613 = vmatprep.mubr.bf16.mxu0 %v1718_v48 }
  0x47   : > { %649 = vmatpush1.bf16.msra.mxu1 %v1547_v49 }
  0x48   : > { %1430 = vmatpush3.bf16.msra.mxu0 %v1549_v50  ;;  %1459 = vmatprep.subr.bf16.mxu1 %v1591_v0 }
  0x49   : > { %1431 = vmatprep.subr.bf16.mxu0 %v1555_v52 }
  0x4a   : > { %655 = vmatmul.mubr.bf16.vlgmr.msra.gmra.mrb[0].mxu1 %v1725_v51 }
  0x4b   : > { %1473 = vmatpush1.bf16.msra.mxu1 %v1556_v53  ;;  %614 = vmatmul.mubr.bf16.gmra.mrb[12].mxu0 %v1731_v54 }
  0x4c   : > { %1432 = vmatpush3.bf16.msra.mxu0 %v1558_v55  ;;  %1460 = vmatprep.subr.bf16.mxu1 %v1591_v0 }
  0x4d   : > { %1433 = vmatprep.subr.bf16.mxu0 %v1559_v56  ;;  %1277 = vmatprep.mubr.msk.bf16.mxu1 %vm544_vm0, %v1737_v57 }
  0x4e   : > { %960 = vmatprep.mubr.bf16.mxu0 %v1665_v22 }
  0x4f   : > { %1474 = vmatpush1.bf16.msra.mxu1 %v1560_v58 }
  0x50   : > { %1434 = vmatpush3.bf16.msra.mxu0 %v1561_v59  ;;  %1461 = vmatprep.subr.bf16.mxu1 %v1591_v0 }
  0x51   : > { %993 = vmatprep.subr.bf16.mxu0 %v1591_v0 }
  0x52   : > { %663 = vmatmul.mubr.bf16.gmra.mrb[4].mxu1 %v1747_v60 }
  0x53   : > { %1475 = vmatpush1.bf16.msra.mxu1 %v1565_v61  ;;  %961 = vmatmul.mubr.bf16.vlgmr.msra.gmra.mrb[16].mxu0 %v1674_v27 }
  0x54   : > { %994 = vmatpush1.bf16.msra.mxu0 %v1556_v53  ;;  %1462 = vmatprep.subr.bf16.mxu1 %v1591_v0 }
  0x55   : > { %995 = vmatprep.subr.bf16.mxu0 %v1591_v0  ;;  %1278 = vmatprep.mubr.msk.bf16.mxu1 %vm544_vm0, %v1755_v62 }
  0x56   : > { %968 = vmatprep.mubr.bf16.mxu0 %v1681_v31 }
  0x57   : > { %1476 = vmatpush1.bf16.msra.mxu1 %v1566_v63 }
  0x58   : > { %996 = vmatpush1.bf16.msra.mxu0 %v1560_v58  ;;  %1463 = vmatprep.subr.bf16.mxu1 %v1591_v0 }
  0x59   : > { %997 = vmatprep.subr.bf16.mxu0 %v1591_v0 }
  0x5a   : > { %671 = vmatmul.mubr.bf16.gmra.mrb[8].mxu1 %v1773_v2 }
  0x5b   : > { %1477 = vmatpush1.bf16.msra.mxu1 %v1570_v4  ;;  %1279 = vmatprep.mubr.msk.bf16.mxu1 %vm544_vm0, %v1779_v5 }
  0x5c   : > { %998 = vmatpush1.bf16.msra.mxu0 %v1565_v61  ;;  %1464 = vmatprep.subr.bf16.mxu1 %v1591_v0 }
  0x5d   : > { %999 = vmatprep.subr.bf16.mxu0 %v1591_v0  ;;  %969 = vmatmul.mubr.bf16.gmra.mrb[20].mxu0 %v1691_v36 }
  0x5e   : > { %976 = vmatprep.mubr.bf16.mxu0 %v1697_v39 }
  0x5f   : > { %1478 = vmatpush1.bf16.msra.mxu1 %v1571_v7 }
  0x60   : > { %1000 = vmatpush1.bf16.msra.mxu0 %v1566_v63  ;;  %1465 = vmatprep.subr.bf16.mxu1 %v1591_v0 }
  0x61   : > { %1001 = vmatprep.subr.bf16.mxu0 %v1591_v0 }
  0x62   : > { %679 = vmatmul.mubr.bf16.gmra.mrb[12].mxu1 %v1794_v10 }
  0x63   : > { %1479 = vmatpush1.bf16.msra.mxu1 %v1575_v11  ;;  %1371 = vmatprep.mubr.msk.bf16.mxu1 %vm544_vm0, %v1737_v57 }
  0x64   : > { %1002 = vmatpush1.bf16.msra.mxu0 %v1570_v4  ;;  %1466 = vmatprep.subr.bf16.mxu1 %v1591_v0 }
  0x65   : > { %1003 = vmatprep.subr.bf16.mxu0 %v1591_v0  ;;  %977 = vmatmul.mubr.bf16.gmra.mrb[24].mxu0 %v1710_v45 }
  0x66   : > { %984 = vmatprep.mubr.bf16.mxu0 %v1718_v48 }
  0x67   : > { %1480 = vmatpush1.bf16.msra.mxu1 %v1576_v13 }
  0x68   : > { %1004 = vmatpush1.bf16.msra.mxu0 %v1571_v7  ;;  %1467 = vmatprep.subr.bf16.mxu1 %v1591_v0 }
  0x69   : > { %1005 = vmatprep.subr.bf16.mxu0 %v1591_v0 }
  0x6b   : > { %1481 = vmatpush1.bf16.msra.mxu1 %v1577_v16 }
  0x6c   : > { %1006 = vmatpush1.bf16.msra.mxu0 %v1575_v11  ;;  %1468 = vmatprep.subr.bf16.mxu1 %v1591_v0 }
  0x6d   : > { %1007 = vmatprep.subr.bf16.mxu0 %v1591_v0  ;;  %985 = vmatmul.mubr.bf16.gmra.mrb[28].mxu0 %v1731_v54 }
  0x6e   : > { %1370 = vmatprep.mubr.msk.bf16.mxu0 %vm544_vm0, %v1707_v44 }
  0x6f   : > { %1482 = vmatpush1.bf16.msra.mxu1 %v1578_v17 }
  0x70   : > { %1008 = vmatpush1.bf16.msra.mxu0 %v1576_v13  ;;  %1469 = vmatprep.subr.bf16.mxu1 %v1591_v0 }
  0x71   : > { %1009 = vmatprep.subr.bf16.mxu0 %v1591_v0 }
  0x73   : > { %1483 = vmatpush1.bf16.msra.mxu1 %v1579_v18 }
  0x74   : > { %1010 = vmatpush1.bf16.msra.mxu0 %v1577_v16  ;;  %1470 = vmatprep.subr.bf16.mxu1 %v1591_v0 }
  0x75   : > { %1011 = vmatprep.subr.bf16.mxu0 %v1591_v0 }
  0x77   : > { %1484 = vmatpush1.bf16.msra.mxu1 %v1580_v19 }
  0x78   : > { %1012 = vmatpush1.bf16.msra.mxu0 %v1578_v17  ;;  %1471 = vmatprep.subr.bf16.mxu1 %v1591_v0 }
  0x79   : > { %1013 = vmatprep.subr.bf16.mxu0 %v1591_v0 }
  0x7b   : > { %1485 = vmatpush1.bf16.msra.mxu1 %v1581_v20 }
  0x7c   : > { %1014 = vmatpush1.bf16.msra.mxu0 %v1579_v18  ;;  %1472 = vmatprep.subr.bf16.mxu1 %v1591_v0 }
  0x7d   : > { %1015 = vmatprep.subr.bf16.mxu0 %v1591_v0 }
  0x7f   : > { %1486 = vmatpush1.bf16.msra.mxu1 %v1582_v21 }
  0x80   : > { %1016 = vmatpush1.bf16.msra.mxu0 %v1580_v19 }
  0x81   : > { %1017 = vmatprep.subr.bf16.mxu0 %v1591_v0 }
  0x82   : > { %1034 = vmatmul.mubr.bf16.vlgmr.msra.gmra.mrb[16].mxu1 %v1747_v60 }
  0x83   : > { %1372 = vmatprep.mubr.msk.bf16.mxu1 %vm544_vm0, %v1755_v62 }
  0x84   : > { %1018 = vmatpush1.bf16.msra.mxu0 %v1581_v20 }
  0x85   : > { %1019 = vmatprep.subr.bf16.mxu0 %v1591_v0 }
  0x88   : > { %1020 = vmatpush1.bf16.msra.mxu0 %v1582_v21 }
  0x8a   : > { %1042 = vmatmul.mubr.bf16.gmra.mrb[20].mxu1 %v1773_v2 }
  0x8b   : > { %1026 = vmatmul.mubr.bf16.vlgmr.msra.gmra.mrb[32].mxu0 %v1725_v51  ;;  %1373 = vmatprep.mubr.msk.bf16.mxu1 %vm544_vm0, %v1779_v5 }
  0x92   : > { %1050 = vmatmul.mubr.bf16.gmra.mrb[24].mxu1 %v1794_v10 }
 0x106   : > { %v1395_v22 = vpop.f32.mrb[0].mxu0 }
 0x107   : > { %v1396_v23 = vpop.f32.mrb[1].mxu0 }
 0x108   : > { %v1397_v24 = vadd.f32 %v1396_v23, %v1395_v22  ;;  %v1398_v25 = vpop.f32.mrb[2].mxu0 }
 0x109   : > { %v1399_v26 = vpop.f32.mrb[3].mxu0 }
 0x10a   : > { %v1400_v27 = vadd.f32 %v1399_v26, %v1398_v25 }
 0x10e   : > { %v1401_v28 = vpop.f32.mrb[4].mxu0 }
 0x10f   : > { %v1402_v29 = vpop.f32.mrb[5].mxu0 }
 0x110   : > { %v1403_v30 = vadd.f32 %v1402_v29, %v1401_v28  ;;  %v1404_v0 = vpop.f32.mrb[6].mxu0 }
 0x111   : > { %v1405_v31 = vpop.f32.mrb[7].mxu0 }
 0x112   : > { %v1406_v32 = vadd.f32 %v1405_v31, %v1404_v0  ;;  %v1077_v0 = vpop.permute.xlu0 %1076 }
 0x116   : > { %v1407_v33 = vpop.f32.mrb[8].mxu0 }
 0x117   : > { %v1408_v34 = vpop.f32.mrb[9].mxu0 }
 0x118   : > { %v1409_v35 = vadd.f32 %v1408_v34, %v1407_v33  ;;  %v1410_v36 = vpop.f32.mrb[10].mxu0 }
 0x119   : > { %v1411_v37 = vpop.f32.mrb[11].mxu0 }
 0x11a   : > { %v1412_v38 = vadd.f32 %v1411_v37, %v1410_v36 }
 0x11d   : > { %v656_v39 = vpop.f32.mrb[0].mxu1 }
 0x11e   : > { %v1842_v40 = vadd.f32 %v1397_v24, %v656_v39  ;;  %v658_v41 = vpop.f32.mrb[1].mxu1  ;;  %v1413_v42 = vpop.f32.mrb[12].mxu0 }
 0x11f   : > { %v659_v43 = vpop.f32.mrb[2].mxu1  ;;  %v1414_v44 = vpop.f32.mrb[13].mxu0 }
 0x120   : > { %v1844_v45 = vadd.f32 %v1400_v27, %v659_v43  ;;  %v661_v46 = vpop.f32.mrb[3].mxu1  ;;  %v1415_v47 = vadd.f32 %v1414_v44, %v1413_v42  ;;  %v1416_v48 = vpop.f32.mrb[14].mxu0 }
 0x121   : > { %v1417_v49 = vpop.f32.mrb[15].mxu0  ;;  %v1082_v42 = vpop.permute.xlu0 %1081 }
 0x122   : > { %v1418_v50 = vadd.f32 %v1417_v49, %v1416_v48 }
 0x125   : > { %v664_v51 = vpop.f32.mrb[4].mxu1 }
 0x126   : > { %v665_v52 = vadd.f32 %v1403_v30, %v664_v51  ;;  %v666_v53 = vpop.f32.mrb[5].mxu1  ;;  %v1435_v54 = vpop.f32.mrb[16].mxu0 }
 0x127   : > { %v667_v55 = vpop.f32.mrb[6].mxu1  ;;  %v1436_v56 = vpop.f32.mrb[17].mxu0 }
 0x128   : > { %v668_v57 = vadd.f32 %v1406_v32, %v667_v55  ;;  %v669_v58 = vpop.f32.mrb[7].mxu1  ;;  %v1437_v59 = vadd.f32 %v1436_v56, %v1435_v54  ;;  %v1438_v60 = vpop.f32.mrb[18].mxu0 }
 0x129   : > { %v1439_v61 = vpop.f32.mrb[19].mxu0  ;;  %v1087_v30 = vpop.permute.xlu1 %1086 }
 0x12a   : > { %v1846_v62 = vadd.f32 %v1439_v61, %v1438_v60  ;;  %v1097_v58 = vpop.permute.xlu0 %1096 }
 0x12d   : > { %v672_v63 = vpop.f32.mrb[8].mxu1  ;;  %v1092_v41 = vpop.permute.xlu1 %1091 }
 0x12e   : > { %v1848_v1 = vadd.f32 %v1409_v35, %v672_v63  ;;  %v674_v2 = vpop.f32.mrb[9].mxu1 }
 0x12f   : > { %v675_v3 = vpop.f32.mrb[10].mxu1 }
 0x130   : > { %v1850_v4 = vadd.f32 %v1412_v38, %v675_v3  ;;  %v677_v5 = vpop.f32.mrb[11].mxu1  ;;  %v1441_v6 = vpop.f32.mrb[20].mxu0 }
 0x131   : > { %v1442_v7 = vpop.f32.mrb[21].mxu0  ;;  %v1102_v3 = vpop.permute.xlu1 %1101 }
 0x132   : > { %v1443_v8 = vadd.f32 %v1442_v7, %v1441_v6  ;;  %v1444_v9 = vpop.f32.mrb[22].mxu0 }
 0x133   : > { %v1445_v10 = vpop.f32.mrb[23].mxu0 }
 0x134   : > { %v1446_v11 = vadd.f32 %v1445_v10, %v1444_v9 }
 0x135   : > { %v680_v12 = vpop.f32.mrb[12].mxu1 }
 0x136   : > { %v1852_v13 = vadd.f32 %v1415_v47, %v680_v12  ;;  %v682_v14 = vpop.f32.mrb[13].mxu1 }
 0x137   : > { %v683_v15 = vpop.f32.mrb[14].mxu1 }
 0x138   : > { %v1854_v16 = vadd.f32 %v1418_v50, %v683_v15  ;;  %v685_v17 = vpop.f32.mrb[15].mxu1  ;;  %v1447_v18 = vpop.f32.mrb[24].mxu0 }
 0x139   : > { %v1448_v19 = vpop.f32.mrb[25].mxu0  ;;  %v1107_v17 = vpop.permute.xlu0 %1106 }
 0x13a   : > { %v1449_v20 = vadd.f32 %v1448_v19, %v1447_v18  ;;  %v1450_v21 = vpop.f32.mrb[26].mxu0 }
 0x13b   : > { %v1451_v22 = vpop.f32.mrb[27].mxu0 }
 0x13c   : > { %v1452_v23 = vadd.f32 %v1451_v22, %v1450_v21 }
 0x140   : > { %v1453_v24 = vpop.f32.mrb[28].mxu0 }
 0x141   : > { %v1454_v25 = vpop.f32.mrb[29].mxu0 }
 0x142   : > { %v1455_v26 = vadd.f32 %v1454_v25, %v1453_v24  ;;  %v1456_v27 = vpop.f32.mrb[30].mxu0 }
 0x143   : > { %v1457_v28 = vpop.f32.mrb[31].mxu0 }
 0x144   : > { %v1458_v29 = vadd.f32 %v1457_v28, %v1456_v27 }
 0x155   : > { %v1035_v31 = vpop.f32.mrb[16].mxu1 }
 0x156   : > { %v1036_v32 = vadd.f32 %v1443_v8, %v1035_v31  ;;  %v1037_v33 = vpop.f32.mrb[17].mxu1 }
 0x157   : > { %v1038_v34 = vpop.f32.mrb[18].mxu1 }
 0x158   : > { %v1060_v35 = vmax.f32 %v665_v52, %v1036_v32  ;;  %v1039_v36 = vadd.f32 %v1446_v11, %v1038_v34  ;;  %v1040_v37 = vpop.f32.mrb[19].mxu1 }
 0x15a   : > { %v1116_v38 = vadd.f32 %v1087_v30, %v1060_v35  ;;  %v1061_v39 = vmax.f32 %v668_v57, %v1039_v36 }
 0x15c   : > { %v1124_v43 = vmax.f32 %v1116_v38, 0.0  ;;  %v1117_v44 = vadd.f32 %v1092_v41, %v1061_v39 }
 0x15d   : > { %v1043_v46 = vpop.f32.mrb[20].mxu1 }
 0x15e   : > { %1133 = vst.msk [vmem:[%s1861_s28 + $0x10] sm:$0xff] %vm1130_vm1, %v1124_v43  ;;  %v1125_v47 = vmax.f32 %v1117_v44, 0.0  ;;  %v1044_v48 = vadd.f32 %v1449_v20, %v1043_v46  ;;  %v1027_v49 = vpop.f32.mrb[32].mxu0  ;;  %v1045_v50 = vpop.f32.mrb[21].mxu1 }
 0x15f   : > { %v1028_v51 = vadd.f32 %v1437_v59, %v1027_v49  ;;  %v1029_v52 = vpop.f32.mrb[33].mxu0  ;;  %v1046_v53 = vpop.f32.mrb[22].mxu1 }
 0x160   : > { %1134 = vst.msk [vmem:[%s1861_s28 + $0x18] sm:$0xff] %vm1130_vm1, %v1125_v47  ;;  %v1062_v54 = vmax.f32 %v1848_v1, %v1044_v48  ;;  %v1047_v55 = vadd.f32 %v1452_v23, %v1046_v53  ;;  %v1030_v56 = vpop.f32.mrb[34].mxu0  ;;  %v1048_v57 = vpop.f32.mrb[23].mxu1 }
 0x161   : > { %v1058_v60 = vmax.f32 %v1842_v40, %v1028_v51  ;;  %v1031_v61 = vadd.f32 %v1846_v62, %v1030_v56  ;;  %v1032_v63 = vpop.f32.mrb[35].mxu0  ;;  %v1112_v20 = vpop.permute.xlu1 %1111 }
 0x162   : > { %v1118_v2 = vadd.f32 %v1097_v58, %v1062_v54  ;;  %v1063_v59 = vmax.f32 %v1850_v4, %v1047_v55 }
 0x163   : > { %v1114_v5 = vadd.f32 %v1077_v0, %v1058_v60  ;;  %v1059_v6 = vmax.f32 %v1844_v45, %v1031_v61 }
 0x164   : > { %v1126_v1 = vmax.f32 %v1118_v2, 0.0  ;;  %v1119_v7 = vadd.f32 %v1102_v3, %v1063_v59 }
 0x165   : > { %v1122_v8 = vmax.f32 %v1114_v5, 0.0  ;;  %v1115_v9 = vadd.f32 %v1082_v42, %v1059_v6  ;;  %v1051_v10 = vpop.f32.mrb[24].mxu1 }
 0x166   : > { %1135 = vst.msk [vmem:[%s1861_s28 + $0x20] sm:$0xff] %vm1130_vm1, %v1126_v1  ;;  %v1127_v40 = vmax.f32 %v1119_v7, 0.0  ;;  %v1052_v62 = vadd.f32 %v1455_v26, %v1051_v10  ;;  %v1053_v11 = vpop.f32.mrb[25].mxu1 }
 0x167   : > { %1131 = vst.msk [vmem:[%s1861_s28] sm:$0xff] %vm1130_vm1, %v1122_v8  ;;  %v1123_v4 = vmax.f32 %v1115_v9, 0.0  ;;  %v1054_v12 = vpop.f32.mrb[26].mxu1 }
 0x168   : > { %1136 = vst.msk [vmem:[%s1861_s28 + $0x28] sm:$0xff] %vm1130_vm1, %v1127_v40  ;;  %v1064_v45 = vmax.f32 %v1852_v13, %v1052_v62  ;;  %v1055_v14 = vadd.f32 %v1458_v29, %v1054_v12  ;;  %v1056_v15 = vpop.f32.mrb[27].mxu1 }
 0x169   : > { %1132 = vst.msk [vmem:[%s1861_s28 + $0x8] sm:$0xff] %vm1130_vm1, %v1123_v4 }
 0x16a   : > { %v1120_v18 = vadd.f32 %v1107_v17, %v1064_v45  ;;  %v1065_v19 = vmax.f32 %v1854_v16, %v1055_v14 }
 0x16c   : > { %v1128_v21 = vmax.f32 %v1120_v18, 0.0  ;;  %v1121_v22 = vadd.f32 %v1112_v20, %v1065_v19 }
 0x16e   : > { %1137 = vst.msk [vmem:[%s1861_s28 + $0x30] sm:$0xff] %vm1130_vm1, %v1128_v21  ;;  %v1129_v23 = vmax.f32 %v1121_v22, 0.0 }
 0x170   : > { %1138 = vst.msk [vmem:[%s1861_s28 + $0x38] sm:$0xff] %vm1130_vm1, %v1129_v23 }
 0x171 PF: > { %s13_s12 = sadd.s32 1, %s1589_s12  }
 0x172   : > { %p10_p4 = scmp.ge.s32.totalorder %s13_s12, 4  }
 0x174   :  { %12 = sbr.rel (!%p10_p4) target bundleno = 1 (0x1), region = 69 }

// kernel: image_dual_net_single_v1_forward.8
= control target key start
LH: loop header
LB: loop body
LE: loop exit
PB: predicated region body
PF: predicated region fallthrough
CT: control target
= control target key end

     0   :  { %s1662_s12 = smov 0   ;;  %s2001_s0 = inlined_call_operand.vmem [shape: bf16[2,4,16,576], index: 0, kind: input, shape index: {}]   ;;  %s2002_s1 = inlined_call_operand.vmem [shape: bf16[2,576,128], index: 1, kind: input, shape index: {}]   ;;  %s2003_s2 = inlined_call_operand.vmem [shape: f32[2,1,128], index: 2, kind: input, shape index: {}]   ;;  %s2004_s3 = inlined_call_operand.vmem [shape: f32[2,16,128], index: 3, kind: output, shape index: {}]  }
   0x1 LB: > { %s1221_s13 = sadd.s32 4294967295, %s1638_s12   ;;  %p1225_p0 = scmp.ge.s32.totalorder %s1638_s12, 1  ;;  %s1638_s12 = sphi %s1662_s12, %s13_s12  }
   0x2   : > { %p155_p1 = scmp.lt.s32.totalorder %s1638_s12, 3 }
   0x4   : > { %p156_p2 = pnand %p1225_p0, %p155_p1 }
   0x5   : > { %p187_p3 = scmp.lt.s32.totalorder (!%p156_p2), %s1221_s13, 1  ;;  %v1640_v34 = vmov (!%p156_p2), 0.0   ;;  %vm1641_vm0 = vmmov (!%p156_p2), 0   ;;  %vm525_vm1 = vcmask (!%p156_p2), 523264  }
   0x6   : > { %159 = sbr.rel (%p156_p2) target bundleno = 409 (0x199), region = 32 }
   0xd   : > { %s2006_s13 = smov (!%p187_p3, %s1221_s13), 1 }
   0xe   : > { %s1557_s14 = smul.u32 288, %s2006_s13  ;;  %s199_s24 = scalar_lea.vmem %s2003_s2, %s2006_s13 }
   0xf   : > { %s1556_s18 = smul.u32 160, %s2006_s13  ;;  %s1311_s25 = sshll.u32 %s2006_s13, 4 }
  0x10   : > { %s1676_s17 = scalar_lea.vmem %s2002_s1, %s1557_s14  ;;  %s204_s28 = scalar_lea.vmem %s2004_s3, %s1311_s25 }
  0x11   : > { %v1679_v0 = vld [vmem:[%s1676_s17 + $0x40] sm:$0xff]   ;;  %v1694_v4 = vld [vmem:[%s1676_s17 + $0x48] sm:$0xff]   ;;  %v1710_v8 = vld [vmem:[%s1676_s17 + $0x50] sm:$0xff]   ;;  %s1800_s21 = scalar_lea.vmem %s2001_s0, %s1556_s18 }
  0x12   : > { %v1682_v1 = vld [vmem:[%s1676_s17 + $0xc0] sm:$0xff]   ;;  %1312 = vmatprep.subr.bf16.mxu0 %v1679_v0  ;;  %v1698_v5 = vld [vmem:[%s1676_s17 + $0xc8] sm:$0xff]   ;;  %v1714_v9 = vld [vmem:[%s1676_s17 + $0xd0] sm:$0xff]  }
  0x13   : > { %v1686_v2 = vld [vmem:[%s1676_s17] sm:$0xff]   ;;  %1334 = vmatprep.subr.bf16.mxu1 %v1682_v1  ;;  %v1702_v6 = vld [vmem:[%s1676_s17 + $0x8] sm:$0xff]   ;;  %v1718_v10 = vld [vmem:[%s1676_s17 + $0x10] sm:$0xff]  }
  0x14   : > { %v1690_v3 = vld [vmem:[%s1676_s17 + $0x80] sm:$0xff]   ;;  %1313 = vmatpush3.bf16.msra.mxu0 %v1686_v2  ;;  %v1706_v7 = vld [vmem:[%s1676_s17 + $0x88] sm:$0xff]   ;;  %v1722_v11 = vld [vmem:[%s1676_s17 + $0x90] sm:$0xff]  }
  0x15   : > { %1335 = vmatpush3.bf16.msra.mxu1 %v1690_v3  ;;  %1314 = vmatprep.subr.bf16.mxu0 %v1694_v4  ;;  %v1726_v12 = vld [vmem:[%s1676_s17 + $0x58] sm:$0xff]   ;;  %v1742_v16 = vld [vmem:[%s1676_s17 + $0x60] sm:$0xff]   ;;  %v1758_v20 = vld [vmem:[%s1676_s17 + $0x68] sm:$0xff]  }
  0x16   : > { %1336 = vmatprep.subr.bf16.mxu1 %v1698_v5  ;;  %v1730_v13 = vld [vmem:[%s1676_s17 + $0xd8] sm:$0xff]   ;;  %v1746_v17 = vld [vmem:[%s1676_s17 + $0xe0] sm:$0xff]   ;;  %v1762_v21 = vld [vmem:[%s1676_s17 + $0xe8] sm:$0xff]  }
  0x17   : > { %v1734_v14 = vld [vmem:[%s1676_s17 + $0x18] sm:$0xff]   ;;  %v1750_v18 = vld [vmem:[%s1676_s17 + $0x20] sm:$0xff]   ;;  %v1766_v22 = vld [vmem:[%s1676_s17 + $0x28] sm:$0xff]  }
  0x18   : > { %1315 = vmatpush3.bf16.msra.mxu0 %v1702_v6  ;;  %v1738_v15 = vld [vmem:[%s1676_s17 + $0x98] sm:$0xff]   ;;  %v1754_v19 = vld [vmem:[%s1676_s17 + $0xa0] sm:$0xff]   ;;  %v1770_v23 = vld [vmem:[%s1676_s17 + $0xa8] sm:$0xff]  }
  0x19   : > { %1337 = vmatpush3.bf16.msra.mxu1 %v1706_v7  ;;  %1316 = vmatprep.subr.bf16.mxu0 %v1710_v8  ;;  %v1774_v24 = vld [vmem:[%s1676_s17 + $0x70] sm:$0xff]   ;;  %v1791_v28 = vld [vmem:[%s1676_s17 + $0x78] sm:$0xff]   ;;  %v1605_v36 = vld [vmem:[%s1800_s21 + $0xc] ss:$20 sps:$4 sm:$0xff]  }
  0x1a   : > { %1338 = vmatprep.subr.bf16.mxu1 %v1714_v9  ;;  %v1778_v25 = vld [vmem:[%s1676_s17 + $0xf0] sm:$0xff]   ;;  %v1795_v29 = vld [vmem:[%s1676_s17 + $0xf8] sm:$0xff]   ;;  %v1819_v37 = vld [vmem:[%s1676_s17 + $0x100] sm:$0xff]   ;;  %602 = vmatprep.mubr.bf16.mxu1 %v1605_v36 }
  0x1b   : > { %v1783_v26 = vld [vmem:[%s1676_s17 + $0x30] sm:$0xff]   ;;  %v1804_v30 = vld [vmem:[%s1676_s17 + $0x38] sm:$0xff]   ;;  %v1823_v38 = vld [vmem:[%s1676_s17 + $0x108] sm:$0xff]  }
  0x1c   : > { %1317 = vmatpush3.bf16.msra.mxu0 %v1718_v10  ;;  %v1787_v27 = vld [vmem:[%s1676_s17 + $0xb0] sm:$0xff]   ;;  %v1808_v31 = vld [vmem:[%s1676_s17 + $0xb8] sm:$0xff]   ;;  %v1613_v39 = vld [vmem:[%s1800_s21 + $0x2c] ss:$20 sps:$4 sm:$0xff]  }
  0x1d   : > { %1339 = vmatpush3.bf16.msra.mxu1 %v1722_v11  ;;  %1318 = vmatprep.subr.bf16.mxu0 %v1726_v12  ;;  %v1600_v32 = vld [vmem:[%s1800_s21] ss:$20 sps:$4 sm:$0xff]   ;;  %v1602_v33 = vld [vmem:[%s1800_s21 + $0x4] ss:$20 sps:$4 sm:$0xff]   ;;  %v1603_v35 = vld [vmem:[%s1800_s21 + $0x8] ss:$20 sps:$4 sm:$0xff]  }
  0x1e   : > { %1340 = vmatprep.subr.bf16.mxu1 %v1730_v13  ;;  %561 = vmatprep.mubr.bf16.mxu0 %v1602_v33  ;;  %v1833_v40 = vld [vmem:[%s1676_s17 + $0x110] sm:$0xff]   ;;  %v1840_v41 = vld [vmem:[%s1676_s17 + $0x118] sm:$0xff]  }
  0x1f   : > { %v1610_v42 = vld [vmem:[%s1800_s21 + $0x10] ss:$20 sps:$4 sm:$0xff]   ;;  %v1616_v43 = vld [vmem:[%s1800_s21 + $0x34] ss:$20 sps:$4 sm:$0xff]   ;;  %v1617_v46 = vld [vmem:[%s1800_s21 + $0x38] ss:$20 sps:$4 sm:$0xff]  }
  0x20   : > { %1319 = vmatpush3.bf16.msra.mxu0 %v1734_v14  ;;  %v1611_v44 = vld [vmem:[%s1800_s21 + $0x28] ss:$20 sps:$4 sm:$0xff]   ;;  %v1614_v45 = vld [vmem:[%s1800_s21 + $0x30] ss:$20 sps:$4 sm:$0xff]   ;;  %v1621_v50 = vld [vmem:[%s1800_s21 + $0x58] ss:$20 sps:$4 sm:$0xff]  }
  0x21   : > { %1341 = vmatpush3.bf16.msra.mxu1 %v1738_v15  ;;  %1320 = vmatprep.subr.bf16.mxu0 %v1742_v16  ;;  %v1620_v47 = vld [vmem:[%s1800_s21 + $0x54] ss:$20 sps:$4 sm:$0xff]   ;;  %v1623_v48 = vld [vmem:[%s1800_s21 + $0x5c] ss:$20 sps:$4 sm:$0xff]   ;;  %v1630_v53 = vld [vmem:[%s1800_s21 + $0x84] ss:$20 sps:$4 sm:$0xff]  }
  0x22   : > { %1342 = vmatprep.subr.bf16.mxu1 %v1746_v17  ;;  %v1618_v49 = vld [vmem:[%s1800_s21 + $0x50] ss:$20 sps:$4 sm:$0xff]   ;;  %v1624_v52 = vld [vmem:[%s1800_s21 + $0x60] ss:$20 sps:$4 sm:$0xff]   ;;  %v1625_v54 = vld [vmem:[%s1800_s21 + $0x78] ss:$20 sps:$4 sm:$0xff]  }
  0x23   : > { %v1627_v51 = vld [vmem:[%s1800_s21 + $0x7c] ss:$20 sps:$4 sm:$0xff]   ;;  %v1628_v55 = vld [vmem:[%s1800_s21 + $0x80] ss:$20 sps:$4 sm:$0xff]  }
  0x24   : > { %1321 = vmatpush3.bf16.msra.mxu0 %v1750_v18  ;;  %v1631_v56 = vld [vmem:[%s1800_s21 + $0x88] ss:$20 sps:$4 sm:$0xff]  }
  0x25   : > { %1343 = vmatpush3.bf16.msra.mxu1 %v1754_v19  ;;  %1322 = vmatprep.subr.bf16.mxu0 %v1758_v20 }
  0x26   : > { %1344 = vmatprep.subr.bf16.mxu1 %v1762_v21 }
  0x28   : > { %1323 = vmatpush3.bf16.msra.mxu0 %v1766_v22 }
  0x29   : > { %1345 = vmatpush3.bf16.msra.mxu1 %v1770_v23  ;;  %1324 = vmatprep.subr.bf16.mxu0 %v1774_v24 }
  0x2a   : > { %1346 = vmatprep.subr.bf16.mxu1 %v1778_v25 }
  0x2c   : > { %1325 = vmatpush3.bf16.msra.mxu0 %v1783_v26 }
  0x2d   : > { %1347 = vmatpush3.bf16.msra.mxu1 %v1787_v27  ;;  %1326 = vmatprep.subr.bf16.mxu0 %v1791_v28 }
  0x2e   : > { %1348 = vmatprep.subr.bf16.mxu1 %v1795_v29 }
  0x30   : > { %1327 = vmatpush3.bf16.msra.mxu0 %v1804_v30 }
  0x31   : > { %1349 = vmatpush3.bf16.msra.mxu1 %v1808_v31  ;;  %1508 = vmatprep.subr.bf16.mxu0 %v1640_v34 }
  0x32   : > { %1361 = vmatprep.subr.bf16.mxu1 %v1679_v0 }
  0x33   : > { %562 = vmatmul.mubr.bf16.vlgmr.msra.gmra.mrb[0].mxu0 %v1600_v32 }
  0x34   : > { %603 = vmatmul.mubr.bf16.vlgmr.msra.gmra.mrb[0].mxu1 %v1603_v35  ;;  %1509 = vmatpush3.bf16.msra.mxu0 %v1819_v37 }
  0x35   : > { %1362 = vmatpush3.bf16.msra.mxu1 %v1686_v2  ;;  %1510 = vmatprep.subr.bf16.mxu0 %v1640_v34 }
  0x36   : > { %1363 = vmatprep.subr.bf16.mxu1 %v1694_v4  ;;  %1516 = vmatprep.mubr.msk.bf16.mxu0 %vm1641_vm0, %v1640_v34 }
  0x37   : > { %719 = vmatprep.mubr.bf16.mxu1 %v1613_v39 }
  0x38   : > { %1511 = vmatpush3.bf16.msra.mxu0 %v1823_v38 }
  0x39   : > { %1364 = vmatpush3.bf16.msra.mxu1 %v1702_v6  ;;  %1512 = vmatprep.subr.bf16.mxu0 %v1640_v34 }
  0x3a   : > { %1365 = vmatprep.subr.bf16.mxu1 %v1710_v8 }
  0x3c   : > { %1513 = vmatpush3.bf16.msra.mxu0 %v1833_v40 }
  0x3d   : > { %1366 = vmatpush3.bf16.msra.mxu1 %v1718_v10  ;;  %1514 = vmatprep.subr.bf16.mxu0 %v1640_v34 }
  0x3e   : > { %1367 = vmatprep.subr.bf16.mxu1 %v1726_v12 }
  0x40   : > { %1515 = vmatpush3.bf16.msra.mxu0 %v1840_v41 }
  0x41   : > { %1368 = vmatpush3.bf16.msra.mxu1 %v1734_v14  ;;  %1383 = vmatprep.subr.bf16.mxu0 %v1682_v1 }
  0x42   : > { %1369 = vmatprep.subr.bf16.mxu1 %v1742_v16 }
  0x43   : > { %1517 = vmatmul.mubr.msk.bf16.vlgmr.msra.gmra.mrb[4].mxu0 %vm525_vm1, %v1610_v42 }
  0x44   : > { %1384 = vmatpush3.bf16.msra.mxu0 %v1690_v3  ;;  %760 = vmatprep.mubr.bf16.mxu0 %v1616_v43 }
  0x45   : > { %1370 = vmatpush3.bf16.msra.mxu1 %v1750_v18  ;;  %1385 = vmatprep.subr.bf16.mxu0 %v1698_v5 }
  0x46   : > { %1371 = vmatprep.subr.bf16.mxu1 %v1758_v20 }
  0x48   : > { %1386 = vmatpush3.bf16.msra.mxu0 %v1706_v7 }
  0x49   : > { %1372 = vmatpush3.bf16.msra.mxu1 %v1766_v22  ;;  %1387 = vmatprep.subr.bf16.mxu0 %v1714_v9 }
  0x4a   : > { %1373 = vmatprep.subr.bf16.mxu1 %v1774_v24 }
  0x4c   : > { %1388 = vmatpush3.bf16.msra.mxu0 %v1722_v11 }
  0x4d   : > { %1374 = vmatpush3.bf16.msra.mxu1 %v1783_v26  ;;  %1389 = vmatprep.subr.bf16.mxu0 %v1730_v13 }
  0x4e   : > { %1375 = vmatprep.subr.bf16.mxu1 %v1791_v28 }
  0x50   : > { %1390 = vmatpush3.bf16.msra.mxu0 %v1738_v15 }
  0x51   : > { %1376 = vmatpush3.bf16.msra.mxu1 %v1804_v30  ;;  %1391 = vmatprep.subr.bf16.mxu0 %v1746_v17 }
  0x52   : > { %1520 = vmatprep.subr.bf16.mxu1 %v1640_v34 }
  0x54   : > { %720 = vmatmul.mubr.bf16.vlgmr.msra.gmra.mrb[4].mxu1 %v1611_v44  ;;  %1392 = vmatpush3.bf16.msra.mxu0 %v1754_v19 }
  0x55   : > { %1521 = vmatpush3.bf16.msra.mxu1 %v1819_v37  ;;  %1393 = vmatprep.subr.bf16.mxu0 %v1762_v21 }
  0x56   : > { %1522 = vmatprep.subr.bf16.mxu1 %v1640_v34  ;;  %1528 = vmatprep.mubr.msk.bf16.mxu1 %vm1641_vm0, %v1640_v34 }
  0x58   : > { %1394 = vmatpush3.bf16.msra.mxu0 %v1770_v23 }
  0x59   : > { %1523 = vmatpush3.bf16.msra.mxu1 %v1823_v38  ;;  %1395 = vmatprep.subr.bf16.mxu0 %v1778_v25 }
  0x5a   : > { %1524 = vmatprep.subr.bf16.mxu1 %v1640_v34 }
  0x5c   : > { %1396 = vmatpush3.bf16.msra.mxu0 %v1787_v27 }
  0x5d   : > { %1525 = vmatpush3.bf16.msra.mxu1 %v1833_v40  ;;  %1397 = vmatprep.subr.bf16.mxu0 %v1795_v29 }
  0x5e   : > { %1526 = vmatprep.subr.bf16.mxu1 %v1640_v34 }
  0x60   : > { %1398 = vmatpush3.bf16.msra.mxu0 %v1808_v31 }
  0x61   : > { %1527 = vmatpush3.bf16.msra.mxu1 %v1840_v41  ;;  %1410 = vmatprep.subr.bf16.mxu0 %v1679_v0 }
  0x62   : > { %1432 = vmatprep.subr.bf16.mxu1 %v1682_v1 }
  0x63   : > { %761 = vmatmul.mubr.bf16.vlgmr.msra.gmra.mrb[8].mxu0 %v1614_v45 }
  0x64   : > { %1529 = vmatmul.mubr.msk.bf16.vlgmr.msra.gmra.mrb[8].mxu1 %vm525_vm1, %v1617_v46  ;;  %1411 = vmatpush3.bf16.msra.mxu0 %v1686_v2 }
  0x65   : > { %1433 = vmatpush3.bf16.msra.mxu1 %v1690_v3  ;;  %1412 = vmatprep.subr.bf16.mxu0 %v1694_v4 }
  0x66   : > { %1434 = vmatprep.subr.bf16.mxu1 %v1698_v5  ;;  %877 = vmatprep.mubr.bf16.mxu0 %v1620_v47 }
  0x67   : > { %918 = vmatprep.mubr.bf16.mxu1 %v1623_v48 }
  0x68   : > { %1413 = vmatpush3.bf16.msra.mxu0 %v1702_v6 }
  0x69   : > { %1435 = vmatpush3.bf16.msra.mxu1 %v1706_v7  ;;  %1414 = vmatprep.subr.bf16.mxu0 %v1710_v8 }
  0x6a   : > { %1436 = vmatprep.subr.bf16.mxu1 %v1714_v9 }
  0x6c   : > { %1415 = vmatpush3.bf16.msra.mxu0 %v1718_v10 }
  0x6d   : > { %1437 = vmatpush3.bf16.msra.mxu1 %v1722_v11  ;;  %1416 = vmatprep.subr.bf16.mxu0 %v1726_v12 }
  0x6e   : > { %1438 = vmatprep.subr.bf16.mxu1 %v1730_v13 }
  0x70   : > { %1417 = vmatpush3.bf16.msra.mxu0 %v1734_v14 }
  0x71   : > { %1439 = vmatpush3.bf16.msra.mxu1 %v1738_v15  ;;  %1418 = vmatprep.subr.bf16.mxu0 %v1742_v16 }
  0x72   : > { %1440 = vmatprep.subr.bf16.mxu1 %v1746_v17 }
  0x74   : > { %1419 = vmatpush3.bf16.msra.mxu0 %v1750_v18 }
  0x75   : > { %1441 = vmatpush3.bf16.msra.mxu1 %v1754_v19  ;;  %1420 = vmatprep.subr.bf16.mxu0 %v1758_v20 }
  0x76   : > { %1442 = vmatprep.subr.bf16.mxu1 %v1762_v21 }
  0x78   : > { %1421 = vmatpush3.bf16.msra.mxu0 %v1766_v22 }
  0x79   : > { %1443 = vmatpush3.bf16.msra.mxu1 %v1770_v23  ;;  %1422 = vmatprep.subr.bf16.mxu0 %v1774_v24 }
  0x7a   : > { %1444 = vmatprep.subr.bf16.mxu1 %v1778_v25 }
  0x7c   : > { %1423 = vmatpush3.bf16.msra.mxu0 %v1783_v26 }
  0x7d   : > { %1445 = vmatpush3.bf16.msra.mxu1 %v1787_v27  ;;  %1424 = vmatprep.subr.bf16.mxu0 %v1791_v28 }
  0x7e   : > { %1446 = vmatprep.subr.bf16.mxu1 %v1795_v29 }
  0x80   : > { %1425 = vmatpush3.bf16.msra.mxu0 %v1804_v30 }
  0x81   : > { %1447 = vmatpush3.bf16.msra.mxu1 %v1808_v31  ;;  %1532 = vmatprep.subr.bf16.mxu0 %v1640_v34 }
  0x82   : > { %1459 = vmatprep.subr.bf16.mxu1 %v1679_v0 }
  0x83   : > { %878 = vmatmul.mubr.bf16.vlgmr.msra.gmra.mrb[12].mxu0 %v1618_v49 }
  0x84   : > { %919 = vmatmul.mubr.bf16.vlgmr.msra.gmra.mrb[12].mxu1 %v1621_v50  ;;  %1533 = vmatpush3.bf16.msra.mxu0 %v1819_v37 }
  0x85   : > { %1460 = vmatpush3.bf16.msra.mxu1 %v1686_v2  ;;  %1534 = vmatprep.subr.bf16.mxu0 %v1640_v34 }
  0x86   : > { %1461 = vmatprep.subr.bf16.mxu1 %v1694_v4  ;;  %1540 = vmatprep.mubr.msk.bf16.mxu0 %vm1641_vm0, %v1640_v34 }
  0x87   : > { %1035 = vmatprep.mubr.bf16.mxu1 %v1627_v51 }
  0x88   : > { %1535 = vmatpush3.bf16.msra.mxu0 %v1823_v38 }
  0x89   : > { %1462 = vmatpush3.bf16.msra.mxu1 %v1702_v6  ;;  %1536 = vmatprep.subr.bf16.mxu0 %v1640_v34 }
  0x8a   : > { %1463 = vmatprep.subr.bf16.mxu1 %v1710_v8 }
  0x8c   : > { %1537 = vmatpush3.bf16.msra.mxu0 %v1833_v40 }
  0x8d   : > { %1464 = vmatpush3.bf16.msra.mxu1 %v1718_v10  ;;  %1538 = vmatprep.subr.bf16.mxu0 %v1640_v34 }
  0x8e   : > { %1465 = vmatprep.subr.bf16.mxu1 %v1726_v12 }
  0x90   : > { %1539 = vmatpush3.bf16.msra.mxu0 %v1840_v41 }
  0x91   : > { %1466 = vmatpush3.bf16.msra.mxu1 %v1734_v14  ;;  %1481 = vmatprep.subr.bf16.mxu0 %v1682_v1 }
  0x92   : > { %1467 = vmatprep.subr.bf16.mxu1 %v1742_v16 }
  0x93   : > { %1541 = vmatmul.mubr.msk.bf16.vlgmr.msra.gmra.mrb[16].mxu0 %vm525_vm1, %v1624_v52 }
  0x94   : > { %1482 = vmatpush3.bf16.msra.mxu0 %v1690_v3  ;;  %1076 = vmatprep.mubr.bf16.mxu0 %v1630_v53 }
  0x95   : > { %1468 = vmatpush3.bf16.msra.mxu1 %v1750_v18  ;;  %1483 = vmatprep.subr.bf16.mxu0 %v1698_v5 }
  0x96   : > { %1469 = vmatprep.subr.bf16.mxu1 %v1758_v20 }
  0x98   : > { %1484 = vmatpush3.bf16.msra.mxu0 %v1706_v7 }
  0x99   : > { %1470 = vmatpush3.bf16.msra.mxu1 %v1766_v22  ;;  %1485 = vmatprep.subr.bf16.mxu0 %v1714_v9 }
  0x9a   : > { %1471 = vmatprep.subr.bf16.mxu1 %v1774_v24 }
  0x9c   : > { %1486 = vmatpush3.bf16.msra.mxu0 %v1722_v11 }
  0x9d   : > { %1472 = vmatpush3.bf16.msra.mxu1 %v1783_v26  ;;  %1487 = vmatprep.subr.bf16.mxu0 %v1730_v13 }
  0x9e   : > { %1473 = vmatprep.subr.bf16.mxu1 %v1791_v28 }
  0xa0   : > { %1488 = vmatpush3.bf16.msra.mxu0 %v1738_v15 }
  0xa1   : > { %1474 = vmatpush3.bf16.msra.mxu1 %v1804_v30  ;;  %1489 = vmatprep.subr.bf16.mxu0 %v1746_v17 }
  0xa2   : > { %1544 = vmatprep.subr.bf16.mxu1 %v1640_v34 }
  0xa4   : > { %1490 = vmatpush3.bf16.msra.mxu0 %v1754_v19  ;;  %1036 = vmatmul.mubr.bf16.vlgmr.msra.gmra.mrb[16].mxu1 %v1625_v54 }
  0xa5   : > { %1545 = vmatpush3.bf16.msra.mxu1 %v1819_v37  ;;  %1491 = vmatprep.subr.bf16.mxu0 %v1762_v21 }
  0xa6   : > { %1546 = vmatprep.subr.bf16.mxu1 %v1640_v34  ;;  %1552 = vmatprep.mubr.msk.bf16.mxu1 %vm1641_vm0, %v1640_v34 }
  0xa8   : > { %1492 = vmatpush3.bf16.msra.mxu0 %v1770_v23 }
  0xa9   : > { %1547 = vmatpush3.bf16.msra.mxu1 %v1823_v38  ;;  %1493 = vmatprep.subr.bf16.mxu0 %v1778_v25 }
  0xaa   : > { %1548 = vmatprep.subr.bf16.mxu1 %v1640_v34 }
  0xac   : > { %1494 = vmatpush3.bf16.msra.mxu0 %v1787_v27 }
  0xad   : > { %1549 = vmatpush3.bf16.msra.mxu1 %v1833_v40  ;;  %1495 = vmatprep.subr.bf16.mxu0 %v1795_v29 }
  0xae   : > { %1550 = vmatprep.subr.bf16.mxu1 %v1640_v34 }
  0xb0   : > { %1496 = vmatpush3.bf16.msra.mxu0 %v1808_v31 }
  0xb1   : > { %1551 = vmatpush3.bf16.msra.mxu1 %v1840_v41 }
  0xb3   : > { %1077 = vmatmul.mubr.bf16.vlgmr.msra.gmra.mrb[20].mxu0 %v1628_v55 }
  0xb4   : > { %1553 = vmatmul.mubr.msk.bf16.vlgmr.msra.gmra.mrb[20].mxu1 %vm525_vm1, %v1631_v56 }
 0x106   : > { %v1328_v57 = vpop.f32.mrb[0].mxu0 }
 0x107   : > { %v1350_v58 = vpop.f32.mrb[0].mxu1  ;;  %v1329_v59 = vpop.f32.mrb[1].mxu0 }
 0x108   : > { %v1330_v60 = vadd.f32 %v1329_v59, %v1328_v57  ;;  %v1351_v61 = vpop.f32.mrb[1].mxu1  ;;  %v1331_v62 = vpop.f32.mrb[2].mxu0 }
 0x109   : > { %v1352_v63 = vadd.f32 %v1351_v61, %v1350_v58  ;;  %v1353_v0 = vpop.f32.mrb[2].mxu1  ;;  %v1332_v1 = vpop.f32.mrb[3].mxu0 }
 0x10a   : > { %v1333_v2 = vadd.f32 %v1332_v1, %v1331_v62  ;;  %v1354_v3 = vpop.f32.mrb[3].mxu1 }
 0x10b   : > { %v1355_v4 = vadd.f32 %v1354_v3, %v1353_v0  ;;  %v605_v5 = vadd.f32 %v1352_v63, %v1330_v60 }
 0x10d   : > { %v608_v6 = vadd.f32 %v1355_v4, %v1333_v2 }
 0x116   : > { %v645_v7 = vpop.f32.mrb[4].mxu0 }
 0x117   : > { %v1984_v8 = vadd.f32 %v645_v7, %v605_v5  ;;  %v1518_v9 = vpop.f32.mrb[5].mxu0 }
 0x118   : > { %v648_v10 = vpop.f32.mrb[6].mxu0 }
 0x119   : > { %v1986_v11 = vadd.f32 %v648_v10, %v608_v6  ;;  %v1519_v12 = vpop.f32.mrb[7].mxu0 }
 0x11a   : > { %v1308_v12 = vld [vmem:[%s199_s24] ss:$0 sm:$0xff] }
 0x127   : > { %v1377_v13 = vpop.f32.mrb[4].mxu1 }
 0x128   : > { %v1378_v14 = vpop.f32.mrb[5].mxu1 }
 0x129   : > { %v1379_v15 = vadd.f32 %v1378_v14, %v1377_v13  ;;  %v1380_v16 = vpop.f32.mrb[6].mxu1 }
 0x12a   : > { %v1381_v17 = vpop.f32.mrb[7].mxu1 }
 0x12b   : > { %v1382_v18 = vadd.f32 %v1381_v17, %v1380_v16 }
 0x136   : > { %v1399_v19 = vpop.f32.mrb[8].mxu0 }
 0x137   : > { %v1400_v20 = vpop.f32.mrb[9].mxu0  ;;  %v803_v21 = vpop.f32.mrb[8].mxu1 }
 0x138   : > { %v1401_v22 = vadd.f32 %v1400_v20, %v1399_v19  ;;  %v1402_v23 = vpop.f32.mrb[10].mxu0  ;;  %v1530_v24 = vpop.f32.mrb[9].mxu1 }
 0x139   : > { %v1403_v25 = vpop.f32.mrb[11].mxu0  ;;  %v806_v26 = vpop.f32.mrb[10].mxu1 }
 0x13a   : > { %v1404_v27 = vadd.f32 %v1403_v25, %v1402_v23  ;;  %v763_v28 = vadd.f32 %v1401_v22, %v1379_v15  ;;  %v1531_v29 = vpop.f32.mrb[11].mxu1 }
 0x13c   : > { %v804_v30 = vadd.f32 %v803_v21, %v763_v28  ;;  %v766_v31 = vadd.f32 %v1404_v27, %v1382_v18 }
 0x13e   : > { %v1126_v32 = vmax.f32 %v1984_v8, %v804_v30  ;;  %v807_v33 = vadd.f32 %v806_v26, %v766_v31 }
 0x140   : > { %v1127_v34 = vmax.f32 %v1986_v11, %v807_v33 }
 0x156   : > { %v1426_v35 = vpop.f32.mrb[12].mxu0 }
 0x157   : > { %v1448_v36 = vpop.f32.mrb[12].mxu1  ;;  %v1427_v37 = vpop.f32.mrb[13].mxu0 }
 0x158   : > { %v1428_v38 = vadd.f32 %v1427_v37, %v1426_v35  ;;  %v1449_v39 = vpop.f32.mrb[13].mxu1  ;;  %v1429_v40 = vpop.f32.mrb[14].mxu0 }
 0x159   : > { %v1450_v41 = vadd.f32 %v1449_v39, %v1448_v36  ;;  %v1451_v42 = vpop.f32.mrb[14].mxu1  ;;  %v1430_v43 = vpop.f32.mrb[15].mxu0 }
 0x15a   : > { %v1431_v44 = vadd.f32 %v1430_v43, %v1429_v40  ;;  %v1452_v45 = vpop.f32.mrb[15].mxu1 }
 0x15b   : > { %v1453_v46 = vadd.f32 %v1452_v45, %v1451_v42  ;;  %v921_v47 = vadd.f32 %v1450_v41, %v1428_v38 }
 0x15d   : > { %v924_v48 = vadd.f32 %v1453_v46, %v1431_v44 }
 0x166   : > { %v961_v49 = vpop.f32.mrb[16].mxu0 }
 0x167   : > { %v962_v50 = vadd.f32 %v961_v49, %v921_v47  ;;  %v1542_v51 = vpop.f32.mrb[17].mxu0 }
 0x168   : > { %v964_v52 = vpop.f32.mrb[18].mxu0 }
 0x169   : > { %v965_v53 = vadd.f32 %v964_v52, %v924_v48  ;;  %v1543_v54 = vpop.f32.mrb[19].mxu0 }
 0x177   : > { %v1475_v55 = vpop.f32.mrb[16].mxu1 }
 0x178   : > { %v1476_v56 = vpop.f32.mrb[17].mxu1 }
 0x179   : > { %v1477_v57 = vadd.f32 %v1476_v56, %v1475_v55  ;;  %v1478_v58 = vpop.f32.mrb[18].mxu1 }
 0x17a   : > { %v1479_v59 = vpop.f32.mrb[19].mxu1 }
 0x17b   : > { %v1480_v60 = vadd.f32 %v1479_v59, %v1478_v58 }
 0x186   : > { %v1497_v61 = vpop.f32.mrb[20].mxu0 }
 0x187   : > { %v1498_v62 = vpop.f32.mrb[21].mxu0  ;;  %v1119_v63 = vpop.f32.mrb[20].mxu1 }
 0x188   : > { %v1499_v0 = vadd.f32 %v1498_v62, %v1497_v61  ;;  %v1500_v1 = vpop.f32.mrb[22].mxu0  ;;  %v1554_v2 = vpop.f32.mrb[21].mxu1 }
 0x189   : > { %v1501_v3 = vpop.f32.mrb[23].mxu0  ;;  %v1122_v4 = vpop.f32.mrb[22].mxu1 }
 0x18a   : > { %v1079_v5 = vadd.f32 %v1499_v0, %v1477_v57  ;;  %v1502_v6 = vadd.f32 %v1501_v3, %v1500_v1  ;;  %v1555_v7 = vpop.f32.mrb[23].mxu1 }
 0x18c   : > { %v1120_v8 = vadd.f32 %v1119_v63, %v1079_v5  ;;  %v1082_v9 = vadd.f32 %v1502_v6, %v1480_v60 }
 0x18e   : > { %v1128_v10 = vmax.f32 %v962_v50, %v1120_v8  ;;  %v1123_v11 = vadd.f32 %v1122_v4, %v1082_v9 }
 0x190   : > { %v1130_v13 = vmax.f32 %v1126_v32, %v1128_v10  ;;  %v1129_v14 = vmax.f32 %v965_v53, %v1123_v11 }
 0x192   : > { %v1139_v15 = vadd.f32 %v1308_v12, %v1130_v13  ;;  %v1131_v16 = vmax.f32 %v1127_v34, %v1129_v14 }
 0x194   : > { %v1141_v17 = vmax.f32 %v1139_v15, 0.0  ;;  %v1140_v18 = vadd.f32 %v1308_v12, %v1131_v16 }
 0x196   : > { %1143 = vst [vmem:[%s204_s28] sm:$0xff] %v1141_v17  ;;  %v1142_v19 = vmax.f32 %v1140_v18, 0.0 }
 0x198   : > { %1144 = vst [vmem:[%s204_s28 + $0x8] sm:$0xff] %v1142_v19 }
 0x199 PF: > { %s13_s12 = sadd.s32 1, %s1638_s12  }
 0x19a   : > { %p10_p4 = scmp.ge.s32.totalorder %s13_s12, 4  }
 0x19c   :  { %12 = sbr.rel (!%p10_p4) target bundleno = 1 (0x1), region = 71 }

// kernel: image_dual_net_single_v1_forward.9
= control target key start
LH: loop header
LB: loop body
LE: loop exit
PB: predicated region body
PF: predicated region fallthrough
CT: control target
= control target key end

     0   :  { %s1468_s12 = smov 0   ;;  %s1582_s0 = inlined_call_operand.vmem [shape: bf16[2,1,16,1152], index: 0, kind: input, shape index: {}]   ;;  %s1583_s1 = inlined_call_operand.vmem [shape: bf16[2,1152,128], index: 1, kind: input, shape index: {}]   ;;  %s1584_s2 = inlined_call_operand.vmem [shape: f32[2,1,128], index: 2, kind: input, shape index: {}]   ;;  %s1585_s3 = inlined_call_operand.vmem [shape: f32[2,16,128], index: 3, kind: output, shape index: {}]  }
   0x1 LB: > { %s1130_s13 = sadd.s32 4294967295, %s1444_s12   ;;  %p1134_p0 = scmp.ge.s32.totalorder %s1444_s12, 1  ;;  %s1444_s12 = sphi %s1468_s12, %s13_s12  }
   0x2   : > { %p155_p1 = scmp.lt.s32.totalorder %s1444_s12, 3 }
   0x4   : > { %p156_p2 = pnand %p1134_p0, %p155_p1 }
   0x5   : > { %p187_p3 = scmp.lt.s32.totalorder (!%p156_p2), %s1130_s13, 1  ;;  %vm1447_vm0 = vmmov (!%p156_p2), 0  }
   0x6   : > { %159 = sbr.rel (%p156_p2) target bundleno = 333 (0x14d), region = 32 }
   0xd   : > { %s1587_s13 = smov (!%p187_p3, %s1130_s13), 1 }
   0xe   : > { %s1342_s14 = smul.u32 576, %s1587_s13  ;;  %s199_s24 = scalar_lea.vmem %s1584_s2, %s1587_s13 }
   0xf   : > { %s1341_s18 = smul.u32 72, %s1587_s13  ;;  %s1223_s25 = sshll.u32 %s1587_s13, 4 }
  0x10   : > { %s1482_s17 = scalar_lea.vmem %s1583_s1, %s1342_s14  ;;  %s204_s28 = scalar_lea.vmem %s1585_s3, %s1223_s25 }
  0x11   : > { %v1353_v0 = vld [vmem:[%s1482_s17 + $0x40] sm:$0xff]   ;;  %v1357_v4 = vld [vmem:[%s1482_s17 + $0x48] sm:$0xff]   ;;  %v1361_v8 = vld [vmem:[%s1482_s17 + $0x50] sm:$0xff]   ;;  %s1517_s21 = scalar_lea.vmem %s1582_s0, %s1341_s18 }
  0x12   : > { %v1354_v1 = vld [vmem:[%s1482_s17] sm:$0xff]   ;;  %1224 = vmatprep.subr.bf16.mxu0 %v1353_v0  ;;  %v1358_v5 = vld [vmem:[%s1482_s17 + $0x8] sm:$0xff]   ;;  %v1362_v9 = vld [vmem:[%s1482_s17 + $0x10] sm:$0xff]  }
  0x13   : > { %v1355_v2 = vld [vmem:[%s1482_s17 + $0xc0] sm:$0xff]   ;;  %1225 = vmatpush3.bf16.msra.mxu0 %v1354_v1  ;;  %v1359_v6 = vld [vmem:[%s1482_s17 + $0xc8] sm:$0xff]   ;;  %v1363_v10 = vld [vmem:[%s1482_s17 + $0xd0] sm:$0xff]  }
  0x14   : > { %v1356_v3 = vld [vmem:[%s1482_s17 + $0x80] sm:$0xff]   ;;  %1246 = vmatprep.subr.bf16.mxu1 %v1355_v2  ;;  %1226 = vmatprep.subr.bf16.mxu0 %v1357_v4  ;;  %v1360_v7 = vld [vmem:[%s1482_s17 + $0x88] sm:$0xff]   ;;  %v1364_v11 = vld [vmem:[%s1482_s17 + $0x90] sm:$0xff]  }
  0x15   : > { %1247 = vmatpush3.bf16.msra.mxu1 %v1356_v3  ;;  %v1365_v12 = vld [vmem:[%s1482_s17 + $0x58] sm:$0xff]   ;;  %v1369_v16 = vld [vmem:[%s1482_s17 + $0x60] sm:$0xff]   ;;  %v1373_v20 = vld [vmem:[%s1482_s17 + $0x68] sm:$0xff]  }
  0x16   : > { %1248 = vmatprep.subr.bf16.mxu1 %v1359_v6  ;;  %v1366_v13 = vld [vmem:[%s1482_s17 + $0x18] sm:$0xff]   ;;  %v1370_v17 = vld [vmem:[%s1482_s17 + $0x20] sm:$0xff]   ;;  %v1374_v21 = vld [vmem:[%s1482_s17 + $0x28] sm:$0xff]   ;;  %v1446_v6 = vmov 0.0  }
  0x17   : > { %1227 = vmatpush3.bf16.msra.mxu0 %v1358_v5  ;;  %v1367_v14 = vld [vmem:[%s1482_s17 + $0xd8] sm:$0xff]   ;;  %v1371_v18 = vld [vmem:[%s1482_s17 + $0xe0] sm:$0xff]   ;;  %v1375_v22 = vld [vmem:[%s1482_s17 + $0xe8] sm:$0xff]  }
  0x18   : > { %1228 = vmatprep.subr.bf16.mxu0 %v1361_v8  ;;  %v1368_v15 = vld [vmem:[%s1482_s17 + $0x98] sm:$0xff]   ;;  %v1372_v19 = vld [vmem:[%s1482_s17 + $0xa0] sm:$0xff]   ;;  %v1376_v23 = vld [vmem:[%s1482_s17 + $0xa8] sm:$0xff]  }
  0x19   : > { %1249 = vmatpush3.bf16.msra.mxu1 %v1360_v7  ;;  %v1377_v24 = vld [vmem:[%s1482_s17 + $0x70] sm:$0xff]   ;;  %v1381_v28 = vld [vmem:[%s1482_s17 + $0x78] sm:$0xff]   ;;  %v1384_v31 = vld [vmem:[%s1517_s21] ss:$36 sps:$4 sm:$0xff]  }
  0x1a   : > { %1250 = vmatprep.subr.bf16.mxu1 %v1363_v10  ;;  %v1378_v25 = vld [vmem:[%s1482_s17 + $0x30] sm:$0xff]   ;;  %v1382_v29 = vld [vmem:[%s1482_s17 + $0x38] sm:$0xff]   ;;  %v1386_v32 = vld [vmem:[%s1517_s21 + $0x4] ss:$36 sps:$4 sm:$0xff]  }
  0x1b   : > { %1229 = vmatpush3.bf16.msra.mxu0 %v1362_v9  ;;  %v1379_v26 = vld [vmem:[%s1482_s17 + $0xf0] sm:$0xff]   ;;  %v1383_v30 = vld [vmem:[%s1482_s17 + $0xf8] sm:$0xff]   ;;  %877 = vmatprep.mubr.bf16.mxu0 %v1386_v32  ;;  %v1388_v34 = vld [vmem:[%s1482_s17 + $0x140] sm:$0xff]  }
  0x1c   : > { %1230 = vmatprep.subr.bf16.mxu0 %v1365_v12  ;;  %v1380_v27 = vld [vmem:[%s1482_s17 + $0xb0] sm:$0xff]   ;;  %v1387_v33 = vld [vmem:[%s1482_s17 + $0xb8] sm:$0xff]   ;;  %v1389_v35 = vld [vmem:[%s1517_s21 + $0x8] ss:$36 sps:$4 sm:$0xff]  }
  0x1d   : > { %1251 = vmatpush3.bf16.msra.mxu1 %v1364_v11  ;;  %v1391_v36 = vld [vmem:[%s1517_s21 + $0xc] ss:$36 sps:$4 sm:$0xff]   ;;  %v1392_v37 = vld [vmem:[%s1482_s17 + $0x100] sm:$0xff]   ;;  %v1403_v48 = vld [vmem:[%s1482_s17 + $0x158] sm:$0xff]  }
  0x1e   : > { %1252 = vmatprep.subr.bf16.mxu1 %v1367_v14  ;;  %918 = vmatprep.mubr.bf16.mxu1 %v1391_v36  ;;  %v1393_v38 = vld [vmem:[%s1482_s17 + $0x1c0] sm:$0xff]   ;;  %v1395_v40 = vld [vmem:[%s1482_s17 + $0x148] sm:$0xff]   ;;  %v1399_v44 = vld [vmem:[%s1482_s17 + $0x150] sm:$0xff]  }
  0x1f   : > { %1231 = vmatpush3.bf16.msra.mxu0 %v1366_v13  ;;  %v1394_v39 = vld [vmem:[%s1482_s17 + $0x180] sm:$0xff]   ;;  %v1396_v41 = vld [vmem:[%s1482_s17 + $0x108] sm:$0xff]   ;;  %v1400_v45 = vld [vmem:[%s1482_s17 + $0x110] sm:$0xff]  }
  0x20   : > { %1232 = vmatprep.subr.bf16.mxu0 %v1369_v16  ;;  %v1397_v42 = vld [vmem:[%s1482_s17 + $0x1c8] sm:$0xff]   ;;  %v1401_v46 = vld [vmem:[%s1482_s17 + $0x1d0] sm:$0xff]   ;;  %v1404_v49 = vld [vmem:[%s1482_s17 + $0x118] sm:$0xff]  }
  0x21   : > { %1253 = vmatpush3.bf16.msra.mxu1 %v1368_v15  ;;  %v1398_v43 = vld [vmem:[%s1482_s17 + $0x188] sm:$0xff]   ;;  %v1402_v47 = vld [vmem:[%s1482_s17 + $0x190] sm:$0xff]   ;;  %v1405_v50 = vld [vmem:[%s1482_s17 + $0x1d8] sm:$0xff]  }
  0x22   : > { %1254 = vmatprep.subr.bf16.mxu1 %v1371_v18  ;;  %v1406_v51 = vld [vmem:[%s1482_s17 + $0x198] sm:$0xff]   ;;  %v1407_v52 = vld [vmem:[%s1482_s17 + $0x160] sm:$0xff]   ;;  %v1411_v56 = vld [vmem:[%s1482_s17 + $0x168] sm:$0xff]  }
  0x23   : > { %1233 = vmatpush3.bf16.msra.mxu0 %v1370_v17  ;;  %v1408_v53 = vld [vmem:[%s1482_s17 + $0x120] sm:$0xff]   ;;  %v1412_v57 = vld [vmem:[%s1482_s17 + $0x128] sm:$0xff]   ;;  %v1415_v60 = vld [vmem:[%s1482_s17 + $0x170] sm:$0xff]  }
  0x24   : > { %1234 = vmatprep.subr.bf16.mxu0 %v1373_v20  ;;  %v1409_v54 = vld [vmem:[%s1482_s17 + $0x1e0] sm:$0xff]   ;;  %v1413_v58 = vld [vmem:[%s1482_s17 + $0x1e8] sm:$0xff]   ;;  %v1416_v61 = vld [vmem:[%s1482_s17 + $0x130] sm:$0xff]  }
  0x25   : > { %1255 = vmatpush3.bf16.msra.mxu1 %v1372_v19  ;;  %v1410_v55 = vld [vmem:[%s1482_s17 + $0x1a0] sm:$0xff]   ;;  %v1414_v59 = vld [vmem:[%s1482_s17 + $0x1a8] sm:$0xff]   ;;  %v1417_v62 = vld [vmem:[%s1482_s17 + $0x1f0] sm:$0xff]  }
  0x26   : > { %1256 = vmatprep.subr.bf16.mxu1 %v1375_v22  ;;  %v1418_v63 = vld [vmem:[%s1482_s17 + $0x1b0] sm:$0xff]   ;;  %v1419_v0 = vld [vmem:[%s1482_s17 + $0x178] sm:$0xff]   ;;  %v1429_v9 = vld [vmem:[%s1482_s17 + $0x200] sm:$0xff]  }
  0x27   : > { %1235 = vmatpush3.bf16.msra.mxu0 %v1374_v21  ;;  %v1420_v1 = vld [vmem:[%s1482_s17 + $0x138] sm:$0xff]   ;;  %v1422_v3 = vld [vmem:[%s1517_s21 + $0x10] ss:$36 sps:$4 sm:$0xff]   ;;  %v1430_v10 = vld [vmem:[%s1482_s17 + $0x208] sm:$0xff]  }
  0x28   : > { %1236 = vmatprep.subr.bf16.mxu0 %v1377_v24  ;;  %v1421_v2 = vld [vmem:[%s1482_s17 + $0x1f8] sm:$0xff]   ;;  %v1431_v11 = vld [vmem:[%s1482_s17 + $0x210] sm:$0xff]   ;;  %v1433_v13 = vld [vmem:[%s1482_s17 + $0x220] sm:$0xff]  }
  0x29   : > { %1257 = vmatpush3.bf16.msra.mxu1 %v1376_v23  ;;  %v1424_v4 = vld [vmem:[%s1517_s21 + $0x14] ss:$36 sps:$4 sm:$0xff]   ;;  %v1428_v8 = vld [vmem:[%s1517_s21 + $0x1c] ss:$36 sps:$4 sm:$0xff]   ;;  %v1434_v14 = vld [vmem:[%s1482_s17 + $0x228] sm:$0xff]  }
  0x2a   : > { %1258 = vmatprep.subr.bf16.mxu1 %v1379_v26  ;;  %v1425_v5 = vld [vmem:[%s1482_s17 + $0x1b8] sm:$0xff]   ;;  %v1435_v15 = vld [vmem:[%s1482_s17 + $0x230] sm:$0xff]   ;;  %v1437_v17 = vld [vmem:[%s1517_s21 + $0x20] ss:$36 sps:$4 sm:$0xff]  }
  0x2b   : > { %1237 = vmatpush3.bf16.msra.mxu0 %v1378_v25  ;;  %v1426_v7 = vld [vmem:[%s1517_s21 + $0x18] ss:$36 sps:$4 sm:$0xff]   ;;  %v1139_v19 = vld [vmem:[%s199_s24] ss:$0 sm:$0xff] }
  0x2c   : > { %1238 = vmatprep.subr.bf16.mxu0 %v1381_v28  ;;  %v1432_v12 = vld [vmem:[%s1482_s17 + $0x218] sm:$0xff]  }
  0x2d   : > { %1259 = vmatpush3.bf16.msra.mxu1 %v1380_v27  ;;  %v1436_v16 = vld [vmem:[%s1482_s17 + $0x238] sm:$0xff]  }
  0x2e   : > { %1260 = vmatprep.subr.bf16.mxu1 %v1383_v30 }
  0x2f   : > { %1239 = vmatpush3.bf16.msra.mxu0 %v1382_v29 }
  0x30   : > { %1268 = vmatprep.subr.bf16.mxu0 %v1388_v34 }
  0x31   : > { %1261 = vmatpush3.bf16.msra.mxu1 %v1387_v33 }
  0x32   : > { %878 = vmatmul.mubr.bf16.vlgmr.msra.gmra.mrb[0].mxu0 %v1384_v31  ;;  %1290 = vmatprep.subr.bf16.mxu1 %v1393_v38 }
  0x33   : > { %1269 = vmatpush3.bf16.msra.mxu0 %v1392_v37  ;;  %959 = vmatprep.mubr.bf16.mxu0 %v1424_v4 }
  0x34   : > { %919 = vmatmul.mubr.bf16.vlgmr.msra.gmra.mrb[0].mxu1 %v1389_v35  ;;  %1270 = vmatprep.subr.bf16.mxu0 %v1395_v40 }
  0x35   : > { %1291 = vmatpush3.bf16.msra.mxu1 %v1394_v39  ;;  %1000 = vmatprep.mubr.bf16.mxu1 %v1428_v8 }
  0x36   : > { %1292 = vmatprep.subr.bf16.mxu1 %v1397_v42 }
  0x37   : > { %1271 = vmatpush3.bf16.msra.mxu0 %v1396_v41 }
  0x38   : > { %1272 = vmatprep.subr.bf16.mxu0 %v1399_v44 }
  0x39   : > { %1293 = vmatpush3.bf16.msra.mxu1 %v1398_v43 }
  0x3a   : > { %1294 = vmatprep.subr.bf16.mxu1 %v1401_v46 }
  0x3b   : > { %1273 = vmatpush3.bf16.msra.mxu0 %v1400_v45 }
  0x3c   : > { %1274 = vmatprep.subr.bf16.mxu0 %v1403_v48 }
  0x3d   : > { %1295 = vmatpush3.bf16.msra.mxu1 %v1402_v47 }
  0x3e   : > { %1296 = vmatprep.subr.bf16.mxu1 %v1405_v50 }
  0x3f   : > { %1275 = vmatpush3.bf16.msra.mxu0 %v1404_v49 }
  0x40   : > { %1276 = vmatprep.subr.bf16.mxu0 %v1407_v52 }
  0x41   : > { %1297 = vmatpush3.bf16.msra.mxu1 %v1406_v51 }
  0x42   : > { %1298 = vmatprep.subr.bf16.mxu1 %v1409_v54 }
  0x43   : > { %1277 = vmatpush3.bf16.msra.mxu0 %v1408_v53 }
  0x44   : > { %1278 = vmatprep.subr.bf16.mxu0 %v1411_v56 }
  0x45   : > { %1299 = vmatpush3.bf16.msra.mxu1 %v1410_v55 }
  0x46   : > { %1300 = vmatprep.subr.bf16.mxu1 %v1413_v58 }
  0x47   : > { %1279 = vmatpush3.bf16.msra.mxu0 %v1412_v57 }
  0x48   : > { %1280 = vmatprep.subr.bf16.mxu0 %v1415_v60 }
  0x49   : > { %1301 = vmatpush3.bf16.msra.mxu1 %v1414_v59 }
  0x4a   : > { %1302 = vmatprep.subr.bf16.mxu1 %v1417_v62 }
  0x4b   : > { %1281 = vmatpush3.bf16.msra.mxu0 %v1416_v61 }
  0x4c   : > { %1282 = vmatprep.subr.bf16.mxu0 %v1419_v0 }
  0x4d   : > { %1303 = vmatpush3.bf16.msra.mxu1 %v1418_v63 }
  0x4e   : > { %1304 = vmatprep.subr.bf16.mxu1 %v1421_v2 }
  0x4f   : > { %1283 = vmatpush3.bf16.msra.mxu0 %v1420_v1 }
  0x50   : > { %1321 = vmatprep.subr.bf16.mxu0 %v1446_v6 }
  0x51   : > { %1305 = vmatpush3.bf16.msra.mxu1 %v1425_v5 }
  0x52   : > { %960 = vmatmul.mubr.bf16.vlgmr.msra.gmra.mrb[4].mxu0 %v1422_v3 }
  0x53   : > { %1337 = vmatprep.mubr.msk.bf16.mxu0 %vm1447_vm0, %v1446_v6  ;;  %1322 = vmatpush3.bf16.msra.mxu0 %v1429_v9 }
  0x54   : > { %1001 = vmatmul.mubr.bf16.vlgmr.msra.gmra.mrb[4].mxu1 %v1426_v7  ;;  %1323 = vmatprep.subr.bf16.mxu0 %v1446_v6 }
  0x57   : > { %1324 = vmatpush3.bf16.msra.mxu0 %v1430_v10 }
  0x58   : > { %1325 = vmatprep.subr.bf16.mxu0 %v1446_v6 }
  0x5b   : > { %1326 = vmatpush3.bf16.msra.mxu0 %v1431_v11 }
  0x5c   : > { %1327 = vmatprep.subr.bf16.mxu0 %v1446_v6 }
  0x5f   : > { %1328 = vmatpush3.bf16.msra.mxu0 %v1432_v12 }
  0x60   : > { %1329 = vmatprep.subr.bf16.mxu0 %v1446_v6 }
  0x63   : > { %1330 = vmatpush3.bf16.msra.mxu0 %v1433_v13 }
  0x64   : > { %1331 = vmatprep.subr.bf16.mxu0 %v1446_v6 }
  0x67   : > { %1332 = vmatpush3.bf16.msra.mxu0 %v1434_v14 }
  0x68   : > { %1333 = vmatprep.subr.bf16.mxu0 %v1446_v6 }
  0x6b   : > { %1334 = vmatpush3.bf16.msra.mxu0 %v1435_v15 }
  0x6c   : > { %1335 = vmatprep.subr.bf16.mxu0 %v1446_v6 }
  0x6f   : > { %1336 = vmatpush3.bf16.msra.mxu0 %v1436_v16 }
  0x72   : > { %1338 = vmatmul.mubr.bf16.vlgmr.msra.gmra.mrb[8].mxu0 %v1437_v17 }
 0x105   : > { %v1240_v18 = vpop.f32.mrb[0].mxu0 }
 0x106   : > { %v1241_v20 = vpop.f32.mrb[1].mxu0 }
 0x107   : > { %v1242_v21 = vadd.f32 %v1241_v20, %v1240_v18  ;;  %v1243_v22 = vpop.f32.mrb[2].mxu0  ;;  %v1262_v23 = vpop.f32.mrb[0].mxu1 }
 0x108   : > { %v1244_v24 = vpop.f32.mrb[3].mxu0  ;;  %v1263_v27 = vpop.f32.mrb[1].mxu1 }
 0x109   : > { %v880_v25 = vadd.f32 %v1242_v21, %v1139_v19  ;;  %v1245_v26 = vadd.f32 %v1244_v24, %v1243_v22  ;;  %v1264_v28 = vadd.f32 %v1263_v27, %v1262_v23  ;;  %v1265_v29 = vpop.f32.mrb[2].mxu1 }
 0x10a   : > { %v1266_v31 = vpop.f32.mrb[3].mxu1 }
 0x10b   : > { %v883_v30 = vadd.f32 %v1245_v26, %v1139_v19  ;;  %v921_v32 = vadd.f32 %v1264_v28, %v880_v25  ;;  %v1267_v33 = vadd.f32 %v1266_v31, %v1265_v29 }
 0x10d   : > { %v924_v34 = vadd.f32 %v1267_v33, %v883_v30 }
 0x125   : > { %v1284_v35 = vpop.f32.mrb[4].mxu0 }
 0x126   : > { %v1285_v36 = vpop.f32.mrb[5].mxu0 }
 0x127   : > { %v1286_v37 = vadd.f32 %v1285_v36, %v1284_v35  ;;  %v1287_v38 = vpop.f32.mrb[6].mxu0  ;;  %v1306_v39 = vpop.f32.mrb[4].mxu1 }
 0x128   : > { %v1288_v40 = vpop.f32.mrb[7].mxu0  ;;  %v1307_v43 = vpop.f32.mrb[5].mxu1 }
 0x129   : > { %v962_v41 = vadd.f32 %v1286_v37, %v921_v32  ;;  %v1289_v42 = vadd.f32 %v1288_v40, %v1287_v38  ;;  %v1308_v44 = vadd.f32 %v1307_v43, %v1306_v39  ;;  %v1309_v45 = vpop.f32.mrb[6].mxu1 }
 0x12a   : > { %v1310_v47 = vpop.f32.mrb[7].mxu1 }
 0x12b   : > { %v965_v46 = vadd.f32 %v1289_v42, %v924_v34  ;;  %v1311_v48 = vadd.f32 %v1310_v47, %v1309_v45  ;;  %v1003_v49 = vadd.f32 %v1308_v44, %v962_v41 }
 0x12d   : > { %v1006_v50 = vadd.f32 %v1311_v48, %v965_v46 }
 0x145   : > { %v1043_v51 = vpop.f32.mrb[8].mxu0 }
 0x146   : > { %v1044_v52 = vadd.f32 %v1043_v51, %v1003_v49  ;;  %v1339_v53 = vpop.f32.mrb[9].mxu0 }
 0x147   : > { %v1046_v54 = vpop.f32.mrb[10].mxu0 }
 0x148   : > { %v1050_v55 = vmax.f32 %v1044_v52, 0.0  ;;  %v1047_v56 = vadd.f32 %v1046_v54, %v1006_v50  ;;  %v1340_v57 = vpop.f32.mrb[11].mxu0 }
 0x14a   : > { %1052 = vst [vmem:[%s204_s28] sm:$0xff] %v1050_v55  ;;  %v1051_v58 = vmax.f32 %v1047_v56, 0.0 }
 0x14c   : > { %1053 = vst [vmem:[%s204_s28 + $0x8] sm:$0xff] %v1051_v58 }
 0x14d PF: > { %s13_s12 = sadd.s32 1, %s1444_s12  }
 0x14e   : > { %p10_p4 = scmp.ge.s32.totalorder %s13_s12, 4  }
 0x150   :  { %12 = sbr.rel (!%p10_p4) target bundleno = 1 (0x1), region = 68 }

</bundles_post_ra>
